<compile_context>
chip_gen: v7x
topology: tpu7x:2x2x1
jax: 0.10.0
libtpu: 0.0.40
codegen_flags: <defaults>
</compile_context>

<pallas_src>
import math

import jax
import jax.numpy as jnp
import numpy as np
from jax.experimental import pallas as pl
from jax.experimental.pallas import tpu as pltpu

# ----------------------------- model hyper-params (small, lane-aligned) ----------------
D_IN = 128      # d_in
D_MODEL = 128   # d_model
D_K = 32        # d_k
D_V = 32        # d_v
H = 4           # heads
D_FF = 256      # d_ff
LN_EPS = 1e-5
NEG = -1e30     # stand-in for -inf in masked_fill (exp underflows to 0 identically)

# weight packing relies on all "fan-in 128" weights sharing the same row count
assert D_IN == D_MODEL == H * D_K == H * D_V

# NOTE: fc_q/fc_k/fc_gk/fc_v/fc_gv/fc_o biases are initialized to exactly 0 by
# init_weights(), so they are omitted (adding zero is identity).


# ----------------------------- parameter init (deterministic, in-script) ---------------
def _xavier(key, fan_in, fan_out):
    bound = math.sqrt(6.0 / (fan_in + fan_out))
    return jax.random.uniform(key, (fan_in, fan_out), jnp.float32, -bound, bound)


def _default_linear(key, fan_in, fan_out):
    # torch default Linear init (uniform +-1/sqrt(fan_in) for weight and bias)
    kw, kb = jax.random.split(key)
    bound = 1.0 / math.sqrt(fan_in)
    w = jax.random.uniform(kw, (fan_in, fan_out), jnp.float32, -bound, bound)
    b = jax.random.uniform(kb, (1, fan_out), jnp.float32, -bound, bound)
    return w, b


def init_params(key):
    ks = jax.random.split(key, 16)
    p = {}
    p["fc_w"], p["fc_b"] = _default_linear(ks[0], D_IN, D_MODEL)
    p["ln0_g"] = jnp.ones((1, D_MODEL), jnp.float32)
    p["ln0_b"] = jnp.zeros((1, D_MODEL), jnp.float32)
    p["wq"] = _xavier(ks[1], D_MODEL, H * D_K)
    p["wk"] = _xavier(ks[2], D_MODEL, H * D_K)
    p["wgk"] = _xavier(ks[3], D_MODEL, H * D_K)
    p["wv"] = _xavier(ks[4], D_MODEL, H * D_V)
    p["wgv"] = _xavier(ks[5], D_MODEL, H * D_V)
    p["wo"] = _xavier(ks[6], H * D_V, D_MODEL)
    p["ln1_g"] = jnp.ones((1, D_MODEL), jnp.float32)
    p["ln1_b"] = jnp.zeros((1, D_MODEL), jnp.float32)
    p["w1"], p["b1"] = _default_linear(ks[7], D_MODEL, D_FF)
    p["w2"], p["b2"] = _default_linear(ks[8], D_FF, D_MODEL)
    p["ln2_g"] = jnp.ones((1, D_MODEL), jnp.float32)
    p["ln2_b"] = jnp.zeros((1, D_MODEL), jnp.float32)
    return p


# ----------------------------- parameter packing (3 lane-aligned slabs) -----------------
def _pack_params(p):
    # all fan-in-128 weights in one lane-aligned bf16 slab (column order must match the
    # kernel's c_* offsets), the single fan-in-256 weight on its own, and every bias /
    # LayerNorm vector as a row of one small f32 slab.
    w128 = jnp.concatenate(
        [p["fc_w"], p["wq"], p["wk"], p["wv"], p["wgk"], p["wgv"], p["wo"], p["w1"]],
        axis=1).astype(jnp.bfloat16)                                   # (128, 1152)
    w256 = p["w2"].astype(jnp.bfloat16)                                # (256, 128)
    vec = jnp.zeros((9, D_FF), jnp.float32)
    rows = ["fc_b", "ln0_g", "ln0_b", "ln1_g", "ln1_b", "ln2_g", "ln2_b", "b2", "b1"]
    for i, name in enumerate(rows):
        val = p[name][0]
        vec = vec.at[i, :val.shape[0]].set(val)
    return w128, w256, vec


# ----------------------------- Pallas kernel -------------------------------------------
def _make_kernel(BT, N, NGP, NG, d_in):
    scale = 1.0 / math.sqrt(D_K)
    BTN = BT * N
    NT = N + NGP
    # column offsets inside the packed (128, 1152) weight slab
    c_fc = 0
    c_qkv = c_fc + D_MODEL                    # wq | wk | wv
    c_g = c_qkv + 3 * H * D_K                 # wgk | wgv
    c_o = c_g + H * D_K + H * D_V             # wo
    c_w1 = c_o + D_MODEL                      # w1
    c_end = c_w1 + D_FF

    def kernel(x_ref, g_ref, w128_ref, w256_ref, vec_ref, out_ref, mh_ref):
        x3 = x_ref[...]                       # (BT, N, d_in) bf16
        x2 = x3.reshape(BTN, d_in)            # layout-preserving (N % 8 == 0)
        g2 = g_ref[...]                       # (BT*NGP, d_model) bf16

        def mm128(a, c0, c1):                 # bf16 MXU matmul, f32 accumulation
            return jnp.dot(a.astype(jnp.bfloat16), w128_ref[:, c0:c1],
                           preferred_element_type=jnp.float32)

        def ln(t, g_, b_):                    # f32 LayerNorm
            mu = jnp.mean(t, axis=-1, keepdims=True)
            var = jnp.mean((t - mu) ** 2, axis=-1, keepdims=True)
            return (t - mu) * jax.lax.rsqrt(var + LN_EPS) * g_ + b_

        fc_b = vec_ref[0:1, 0:D_MODEL]
        ln0_g = vec_ref[1:2, 0:D_MODEL]; ln0_b = vec_ref[2:3, 0:D_MODEL]
        ln1_g = vec_ref[3:4, 0:D_MODEL]; ln1_b = vec_ref[4:5, 0:D_MODEL]
        ln2_g = vec_ref[5:6, 0:D_MODEL]; ln2_b = vec_ref[6:7, 0:D_MODEL]
        b2 = vec_ref[7:8, 0:D_MODEL]
        b1 = vec_ref[8:9, 0:D_FF]

        # ---- input projection + ReLU + (dropout = id) + LayerNorm on the full token slab
        h0 = mm128(x2, c_fc, c_fc + D_MODEL) + fc_b
        h0 = ln(jnp.maximum(h0, 0.0), ln0_g, ln0_b)

        # ---- padding-key additive bias, computed ONCE (hoisted out of attention).
        # Row sums land on the key/lane axis via a bf16 batched matmul against ones
        # (avoids an in-kernel transpose; all-zero rows sum to exactly 0 in any
        # precision).  Real grid keys are never masked; padded grid slots always are.
        ones_row = jnp.ones((BT, 1, d_in), jnp.bfloat16)
        ksum = jnp.einsum("bod,bnd->bon", ones_row, x3,
                          preferred_element_type=jnp.float32)          # (BT, 1, N)
        bias_parts = [jnp.where(ksum == 0.0, NEG, 0.0),
                      jnp.zeros((BT, 1, NG), jnp.float32)]
        if NGP > NG:
            bias_parts.append(jnp.full((BT, 1, NGP - NG), NEG, jnp.float32))
        att_bias = jnp.concatenate(bias_parts, axis=-1)                # (BT, 1, NT)
        att_bias = jnp.concatenate([att_bias] * H, axis=0)             # (H*BT, 1, NT)

        # ---- fused q|k|v and gk|gv projections (one matmul each), single bf16 cast
        qkv = mm128(h0, c_qkv, c_g).astype(jnp.bfloat16)               # (BT*N, 3*H*D_K)
        gkv = mm128(g2, c_g, c_o).astype(jnp.bfloat16)                 # (BT*NGP, 2*H*D_K)
        q3 = qkv[:, 0:H * D_K].reshape(BT, N, H * D_K)
        k3 = qkv[:, H * D_K:2 * H * D_K].reshape(BT, N, H * D_K)
        v3 = qkv[:, 2 * H * D_K:3 * H * D_K].reshape(BT, N, H * D_V)
        gk3 = gkv[:, 0:H * D_K].reshape(BT, NGP, H * D_K)
        gv3 = gkv[:, H * D_K:H * D_K + H * D_V].reshape(BT, NGP, H * D_V)
        k_new = jnp.concatenate([k3, gk3], axis=1)                     # (BT, NT, H*D_K)
        v_new = jnp.concatenate([v3, gv3], axis=1)                     # (BT, NT, H*D_V)

        # ---- fold heads into the batch axis -> ONE batched score matmul, ONE softmax,
        # ONE batched PV matmul for all H heads (no per-head loop / per-head reductions).
        q_bh = jnp.concatenate(
            [q3[:, :, hh * D_K:(hh + 1) * D_K] for hh in range(H)], axis=0)     # (H*BT, N, D_K)
        k_bh = jnp.concatenate(
            [k_new[:, :, hh * D_K:(hh + 1) * D_K] for hh in range(H)], axis=0)   # (H*BT, NT, D_K)
        v_bh = jnp.concatenate(
            [v_new[:, :, hh * D_V:(hh + 1) * D_V] for hh in range(H)], axis=0)   # (H*BT, NT, D_V)

        att = jnp.einsum("bqd,bkd->bqk", q_bh, k_bh,
                         preferred_element_type=jnp.float32) * scale + att_bias
        att = att - jnp.max(att, axis=-1, keepdims=True)
        p = jnp.exp(att)
        p = p * pl.reciprocal(jnp.sum(p, axis=-1, keepdims=True), approx=True)
        o_bh = jnp.einsum("bqk,bkd->bqd", p.astype(jnp.bfloat16), v_bh,
                          preferred_element_type=jnp.float32)          # (H*BT, N, D_V)

        # ---- regroup heads on the lane axis via a VMEM scratch (no 4-way lane concat)
        for hh in range(H):
            mh_ref[:, hh * D_V:(hh + 1) * D_V] = (
                o_bh[hh * BT:(hh + 1) * BT].reshape(BTN, D_V).astype(jnp.bfloat16))
        attn_out = mm128(mh_ref[...], c_o, c_w1)                       # fc_o (K = 128)
        h1 = ln(h0 + attn_out, ln1_g, ln1_b)

        # ---- position-wise FFN + residual + LayerNorm
        f = jnp.maximum(mm128(h1, c_w1, c_end) + b1, 0.0)
        f = jnp.dot(f.astype(jnp.bfloat16), w256_ref[...],
                    preferred_element_type=jnp.float32) + b2
        y = ln(h1 + f, ln2_g, ln2_b)

        # NOTE: on v5e this writeback could be emitted in bf16 to halve store traffic if
        # the consumer tolerates it; kept f32 to preserve the module's output dtype.
        out_ref[...] = y.reshape(BT, N, D_MODEL)                       # 128-lane dense store

    return kernel


# ----------------------------- tiling heuristics ----------------------------------------
def _pick_tiling(B, N, NGP, vmem_cap_bytes):
    """Batch-tile size (in batch elements) and generation-aware VMEM limit."""
    is_small_vmem = vmem_cap_bytes < 96 * 1024 * 1024       # v7x: 64 MiB per TensorCore
    vmem_limit = 48 * 1024 * 1024 if is_small_vmem else 64 * 1024 * 1024
    nt = N + NGP
    # rough per-token-row VMEM bytes: pipelined x/out blocks (double-buffered) plus the
    # dominant in-kernel activations (qkv, ffn hidden, folded q/k/v, scores, probs).
    per_row = (2 * 2 * D_IN + 2 * 4 * D_MODEL
               + (4 + 2) * 3 * H * D_K
               + 4 * 4 * D_MODEL + (4 + 2) * D_FF
               + (4 + 2) * H * nt
               + 2 * (2 * H * D_K + H * D_V) + 2 * H * D_V)
    max_rows = max(N, (vmem_limit // 2) // per_row)
    # ~512 token rows per step fills the 256-wide MXU M dim (v6e/v7x) and amortizes the
    # ~0.35us/step overhead; >=256 is already plenty for v5e's 128-wide MXU.
    rows = min(512, max_rows)
    target_bt = max(1, rows // N)
    # prefer a BT that divides B: no batch padding and no out[:B] epilogue copy
    divisors = [d for d in range(1, B + 1) if B % d == 0 and d <= target_bt]
    best_div = max(divisors) if divisors else 1
    if best_div * N * 2 >= min(rows, B * N):
        bt = best_div
    else:
        bt = min(target_bt, B)                               # fallback -> batch padding
    # v7x: 2 TensorCores share the ("parallel",) grid axis -- keep >= 2 steps once the
    # slab is big enough that splitting still leaves >= 256 rows per step.
    if is_small_vmem and bt == B and B % 2 == 0 and (B // 2) * N >= 256:
        bt = B // 2
    return bt, vmem_limit


# ----------------------------- wrapper ---------------------------------------------------
def grid_augmented_encoder(x, input_grid, params):
    """x: (B, N, d_in) f32; input_grid: (B, d_model) or (B, NG, d_model) f32."""
    if input_grid.ndim == 2:
        input_grid = input_grid[:, None, :]            # matches key_grid.unsqueeze(1)
    B, N, d_in = x.shape
    NG = input_grid.shape[1]
    assert d_in == D_IN and input_grid.shape[2] == D_MODEL and N % 8 == 0

    # pad the grid axis up to the sublane multiple; padded slots are masked in-kernel
    NGP = max(8, ((NG + 7) // 8) * 8)
    if NGP != NG:
        input_grid = jnp.concatenate(
            [input_grid, jnp.zeros((B, NGP - NG, D_MODEL), input_grid.dtype)], axis=1)

    # generation-aware VMEM limit + batch-tile size
    try:
        vmem_cap = getattr(pltpu.get_tpu_info(), "vmem_capacity_bytes", 64 * 1024 * 1024)
    except Exception:
        vmem_cap = 64 * 1024 * 1024
    BT, vmem_limit = _pick_tiling(B, N, NGP, vmem_cap)

    Bp = pl.cdiv(B, BT) * BT
    if Bp != B:  # only when no divisor of B fits the row target; all-zero pad rows behave
        #          as padding tokens and are sliced off below
        x = jnp.concatenate([x, jnp.zeros((Bp - B, N, d_in), x.dtype)], axis=0)
        input_grid = jnp.concatenate(
            [input_grid, jnp.zeros((Bp - B, NGP, D_MODEL), input_grid.dtype)], axis=0)
    nb = Bp // BT

    w128, w256, vec = _pack_params(params)
    xb = x.astype(jnp.bfloat16)                        # halve activation DMA bytes
    g_flat = input_grid.astype(jnp.bfloat16).reshape(Bp * NGP, D_MODEL)

    kernel = _make_kernel(BT, N, NGP, NG, d_in)
    out = pl.pallas_call(
        kernel,
        out_shape=jax.ShapeDtypeStruct((Bp, N, D_MODEL), jnp.float32),
        grid=(nb,),
        in_specs=[
            pl.BlockSpec((BT, N, d_in), lambda b: (b, 0, 0)),
            pl.BlockSpec((BT * NGP, D_MODEL), lambda b: (b, 0)),
            # constant index maps: the three parameter slabs are DMA'd once and
            # revisited across grid steps (not re-copied each iteration).
            pl.BlockSpec(w128.shape, lambda b: (0, 0)),
            pl.BlockSpec(w256.shape, lambda b: (0, 0)),
            pl.BlockSpec(vec.shape, lambda b: (0, 0)),
        ],
        out_specs=pl.BlockSpec((BT, N, D_MODEL), lambda b: (b, 0, 0)),
        scratch_shapes=[pltpu.VMEM((BT * N, H * D_V), jnp.bfloat16)],
        compiler_params=pltpu.CompilerParams(
            dimension_semantics=("parallel",),
            vmem_limit_bytes=vmem_limit),
    )(xb, g_flat, w128, w256, vec)
    return out if Bp == B else out[:B]


# ----------------------------- pure-JAX f32 reference (for verification) ----------------
def reference(x, input_grid, p):
    if input_grid.ndim == 2:
        input_grid = input_grid[:, None, :]

    def ln(t, gamma, beta):
        mu = jnp.mean(t, axis=-1, keepdims=True)
        var = jnp.mean((t - mu) ** 2, axis=-1, keepdims=True)
        return (t - mu) * jax.lax.rsqrt(var + LN_EPS) * gamma + beta

    B, N, _ = x.shape
    h0 = jax.nn.relu(x @ p["fc_w"] + p["fc_b"][0])
    h0 = ln(h0, p["ln0_g"][0], p["ln0_b"][0])
    mask = (jnp.sum(x, -1) == 0.0)                            # (B, N) True = masked

    q = h0 @ p["wq"]
    k = h0 @ p["wk"]
    v = h0 @ p["wv"]
    gk = input_grid @ p["wgk"]
    gv = input_grid @ p["wgv"]
    k_new = jnp.concatenate([k, gk], axis=1)
    v_new = jnp.concatenate([v, gv], axis=1)
    NT = k_new.shape[1]
    qh = q.reshape(B, N, H, D_K).transpose(0, 2, 1, 3)
    kh = k_new.reshape(B, NT, H, D_K).transpose(0, 2, 1, 3)
    vh = v_new.reshape(B, NT, H, D_V).transpose(0, 2, 1, 3)
    att = jnp.einsum("bhqd,bhkd->bhqk", qh, kh) / math.sqrt(D_K)
    full_mask = jnp.concatenate([mask, jnp.zeros((B, NT - N), bool)], axis=1)
    att = jnp.where(full_mask[:, None, None, :], NEG, att)
    att = jax.nn.softmax(att, axis=-1)
    o = jnp.einsum("bhqk,bhkd->bhqd", att, vh).transpose(0, 2, 1, 3).reshape(B, N, H * D_V)
    o = o @ p["wo"]
    h1 = ln(h0 + o, p["ln1_g"][0], p["ln1_b"][0])
    f = jax.nn.relu(h1 @ p["w1"] + p["b1"][0]) @ p["w2"] + p["b2"][0]
    return ln(h1 + f, p["ln2_g"][0], p["ln2_b"][0])


# ----------------------------- main -----------------------------------------------------
if __name__ == "__main__":
    B, N = 2, 8
    key = jax.random.PRNGKey(0)
    k_p, k_x, k_g = jax.random.split(key, 3)

    params = init_params(k_p)
    x = jax.random.normal(k_x, (B, N, D_IN), jnp.float32)
    # make one token a padding token (all zeros) so the attention-mask path is exercised
    x = x.at[0, -1, :].set(0.0)
    input_grid = jax.random.normal(k_g, (B, D_MODEL), jnp.float32)   # 2-D case -> unsqueeze(1)

    out = jax.block_until_ready(grid_augmented_encoder(x, input_grid, params))
    ref = jax.block_until_ready(reference(x, input_grid, params))

    # tolerance covers bf16 MXU inputs (f32 accumulation) + approx-reciprocal softmax
    # vs. the pure-f32 reference
    np.testing.assert_allclose(np.asarray(out), np.asarray(ref), rtol=5e-2, atol=5e-2)
    assert out.shape == (B, N, D_MODEL)
    assert bool(jnp.all(jnp.isfinite(out)))

    print("KERNEL_OK")
</pallas_src>

<mosaic_0001>
module attributes {stable_mosaic.version = 11 : i64} {
  func.func @kernel(%arg0: i32, %arg1: memref<2x8x128xbf16, #tpu.memory_space<vmem>>, %arg2: memref<16x128xbf16, #tpu.memory_space<vmem>>, %arg3: memref<128x1152xbf16, #tpu.memory_space<vmem>>, %arg4: memref<256x128xbf16, #tpu.memory_space<vmem>>, %arg5: memref<9x256xf32, #tpu.memory_space<vmem>>, %arg6: memref<2x8x128xf32, #tpu.memory_space<vmem>>, %arg7: memref<16x128xbf16, #tpu.memory_space<vmem>>) attributes {dimension_semantics = [#tpu.dimension_semantics<parallel>], iteration_bounds = array<i64: 1>, scalar_prefetch = 0 : i64, scratch_operands = 1 : i64, tpu.core_type = #tpu.core_type<tc>, window_params = [{transform_indices = @transform_0, window_bounds = array<i64: 2, 8, 128>}, {transform_indices = @transform_1, window_bounds = array<i64: 16, 128>}, {pipeline_mode = #tpu.pipeline_mode<synchronous>, transform_indices = @transform_2, window_bounds = array<i64: 128, 1152>}, {pipeline_mode = #tpu.pipeline_mode<synchronous>, transform_indices = @transform_3, window_bounds = array<i64: 256, 128>}, {pipeline_mode = #tpu.pipeline_mode<synchronous>, transform_indices = @transform_4, window_bounds = array<i64: 9, 256>}, {transform_indices = @transform_5, window_bounds = array<i64: 2, 8, 128>}]} {
    %c0 = arith.constant 0 : index
    %c0_0 = arith.constant 0 : index
    %c0_1 = arith.constant 0 : index
    %0 = vector.load %arg1[%c0, %c0_0, %c0_1] : memref<2x8x128xbf16, #tpu.memory_space<vmem>>, vector<2x8x128xbf16>
    %1 = vector.shape_cast %0 : vector<2x8x128xbf16> to vector<16x128xbf16>
    %c0_2 = arith.constant 0 : index
    %c0_3 = arith.constant 0 : index
    %2 = vector.load %arg2[%c0_2, %c0_3] : memref<16x128xbf16, #tpu.memory_space<vmem>>, vector<16x128xbf16>
    %c0_4 = arith.constant 0 : index
    %c0_5 = arith.constant 0 : index
    %3 = vector.load %arg5[%c0_4, %c0_5] : memref<9x256xf32, #tpu.memory_space<vmem>>, vector<1x128xf32>
    %c1 = arith.constant 1 : index
    %c0_6 = arith.constant 0 : index
    %4 = vector.load %arg5[%c1, %c0_6] : memref<9x256xf32, #tpu.memory_space<vmem>>, vector<1x128xf32>
    %c2 = arith.constant 2 : index
    %c0_7 = arith.constant 0 : index
    %5 = vector.load %arg5[%c2, %c0_7] : memref<9x256xf32, #tpu.memory_space<vmem>>, vector<1x128xf32>
    %c3 = arith.constant 3 : index
    %c0_8 = arith.constant 0 : index
    %6 = vector.load %arg5[%c3, %c0_8] : memref<9x256xf32, #tpu.memory_space<vmem>>, vector<1x128xf32>
    %c4 = arith.constant 4 : index
    %c0_9 = arith.constant 0 : index
    %7 = vector.load %arg5[%c4, %c0_9] : memref<9x256xf32, #tpu.memory_space<vmem>>, vector<1x128xf32>
    %c5 = arith.constant 5 : index
    %c0_10 = arith.constant 0 : index
    %8 = vector.load %arg5[%c5, %c0_10] : memref<9x256xf32, #tpu.memory_space<vmem>>, vector<1x128xf32>
    %c6 = arith.constant 6 : index
    %c0_11 = arith.constant 0 : index
    %9 = vector.load %arg5[%c6, %c0_11] : memref<9x256xf32, #tpu.memory_space<vmem>>, vector<1x128xf32>
    %c7 = arith.constant 7 : index
    %c0_12 = arith.constant 0 : index
    %10 = vector.load %arg5[%c7, %c0_12] : memref<9x256xf32, #tpu.memory_space<vmem>>, vector<1x128xf32>
    %c8 = arith.constant 8 : index
    %c0_13 = arith.constant 0 : index
    %11 = vector.load %arg5[%c8, %c0_13] : memref<9x256xf32, #tpu.memory_space<vmem>>, vector<1x256xf32>
    %c0_14 = arith.constant 0 : index
    %c0_15 = arith.constant 0 : index
    %12 = vector.load %arg3[%c0_14, %c0_15] : memref<128x1152xbf16, #tpu.memory_space<vmem>>, vector<128x128xbf16>
    %cst = arith.constant dense<0.000000e+00> : vector<16x128xf32>
    %13 = tpu.matmul %1, %12, %cst {dimension_numbers = #tpu.dot_dimension_numbers<[1], [0], [0], [1], [0, 0, 1, 1], [], []>} : vector<16x128xbf16>, vector<128x128xbf16>, vector<16x128xf32> -> vector<16x128xf32>
    %14 = vector.broadcast %3 : vector<1x128xf32> to vector<16x128xf32>
    %15 = arith.addf %13, %14 : vector<16x128xf32>
    %cst_16 = arith.constant 0.000000e+00 : f32
    %16 = vector.broadcast %cst_16 : f32 to vector<16x128xf32>
    %17 = arith.maximumf %15, %16 : vector<16x128xf32>
    %cst_17 = arith.constant dense<0.000000e+00> : vector<16xf32>
    %18 = vector.multi_reduction <add>, %17, %cst_17 [1] : vector<16x128xf32> to vector<16xf32>
    %19 = vector.shape_cast %18 : vector<16xf32> to vector<16x1xf32>
    %cst_18 = arith.constant 1.280000e+02 : f32
    %20 = vector.broadcast %cst_18 : f32 to vector<16x1xf32>
    %21 = arith.divf %19, %20 : vector<16x1xf32>
    %22 = vector.broadcast %21 : vector<16x1xf32> to vector<16x128xf32>
    %23 = arith.subf %17, %22 : vector<16x128xf32>
    %24 = arith.mulf %23, %23 : vector<16x128xf32>
    %cst_19 = arith.constant dense<0.000000e+00> : vector<16xf32>
    %25 = vector.multi_reduction <add>, %24, %cst_19 [1] : vector<16x128xf32> to vector<16xf32>
    %26 = vector.shape_cast %25 : vector<16xf32> to vector<16x1xf32>
    %cst_20 = arith.constant 1.280000e+02 : f32
    %27 = vector.broadcast %cst_20 : f32 to vector<16x1xf32>
    %28 = arith.divf %26, %27 : vector<16x1xf32>
    %29 = vector.broadcast %21 : vector<16x1xf32> to vector<16x128xf32>
    %30 = arith.subf %17, %29 : vector<16x128xf32>
    %cst_21 = arith.constant 9.99999974E-6 : f32
    %31 = vector.broadcast %cst_21 : f32 to vector<16x1xf32>
    %32 = arith.addf %28, %31 : vector<16x1xf32>
    %33 = math.rsqrt %32 : vector<16x1xf32>
    %34 = vector.broadcast %33 : vector<16x1xf32> to vector<16x128xf32>
    %35 = arith.mulf %30, %34 : vector<16x128xf32>
    %36 = vector.broadcast %4 : vector<1x128xf32> to vector<16x128xf32>
    %37 = arith.mulf %35, %36 : vector<16x128xf32>
    %38 = vector.broadcast %5 : vector<1x128xf32> to vector<16x128xf32>
    %39 = arith.addf %37, %38 : vector<16x128xf32>
    %cst_22 = arith.constant 1.000000e+00 : bf16
    %40 = vector.broadcast %cst_22 : bf16 to vector<2x1x128xbf16>
    "tpu.trace_start"() <{level = 10 : i32, message = "bod,bnd->bon"}> : () -> ()
    %cst_23 = arith.constant dense<0.000000e+00> : vector<2x1x8xf32>
    %41 = tpu.matmul %40, %0, %cst_23 {dimension_numbers = #tpu.dot_dimension_numbers<[2], [2], [1], [1], [0, 0, 0, 1, 1, 1], [0], [0]>} : vector<2x1x128xbf16>, vector<2x8x128xbf16>, vector<2x1x8xf32> -> vector<2x1x8xf32>
    %cst_24 = arith.constant 0.000000e+00 : f32
    "tpu.trace_stop"() : () -> ()
    %42 = vector.broadcast %cst_24 : f32 to vector<2x1x8xf32>
    %43 = arith.cmpf oeq, %41, %42 : vector<2x1x8xf32>
    %cst_25 = arith.constant -1.000000e+30 : f32
    %cst_26 = arith.constant 0.000000e+00 : f32
    %44 = vector.broadcast %cst_25 : f32 to vector<2x1x8xf32>
    %45 = vector.broadcast %cst_26 : f32 to vector<2x1x8xf32>
    %46 = arith.select %43, %44, %45 : vector<2x1x8xi1>, vector<2x1x8xf32>
    %cst_27 = arith.constant 0.000000e+00 : f32
    %47 = vector.broadcast %cst_27 : f32 to vector<2x1x1xf32>
    %cst_28 = arith.constant -1.000000e+30 : f32
    %48 = vector.broadcast %cst_28 : f32 to vector<2x1x7xf32>
    %49 = tpu.concatenate %46, %47, %48 in 2 : vector<2x1x8xf32>, vector<2x1x1xf32>, vector<2x1x7xf32> -> vector<2x1x16xf32>
    %50 = tpu.concatenate %49, %49, %49, %49 in 0 : vector<2x1x16xf32>, vector<2x1x16xf32>, vector<2x1x16xf32>, vector<2x1x16xf32> -> vector<8x1x16xf32>
    %51 = arith.truncf %39 : vector<16x128xf32> to vector<16x128xbf16>
    %c0_29 = arith.constant 0 : index
    %c128 = arith.constant 128 : index
    %52 = vector.load %arg3[%c0_29, %c128] : memref<128x1152xbf16, #tpu.memory_space<vmem>>, vector<128x384xbf16>
    %cst_30 = arith.constant dense<0.000000e+00> : vector<16x384xf32>
    %53 = tpu.matmul %51, %52, %cst_30 {dimension_numbers = #tpu.dot_dimension_numbers<[1], [0], [0], [1], [0, 0, 1, 1], [], []>} : vector<16x128xbf16>, vector<128x384xbf16>, vector<16x384xf32> -> vector<16x384xf32>
    %54 = arith.truncf %53 : vector<16x384xf32> to vector<16x384xbf16>
    %c0_31 = arith.constant 0 : index
    %c512 = arith.constant 512 : index
    %55 = vector.load %arg3[%c0_31, %c512] : memref<128x1152xbf16, #tpu.memory_space<vmem>>, vector<128x256xbf16>
    %cst_32 = arith.constant dense<0.000000e+00> : vector<16x256xf32>
    %56 = tpu.matmul %2, %55, %cst_32 {dimension_numbers = #tpu.dot_dimension_numbers<[1], [0], [0], [1], [0, 0, 1, 1], [], []>} : vector<16x128xbf16>, vector<128x256xbf16>, vector<16x256xf32> -> vector<16x256xf32>
    %57 = arith.truncf %56 : vector<16x256xf32> to vector<16x256xbf16>
    %58 = vector.extract_strided_slice %54 {offsets = [0, 0], sizes = [16, 128], strides = [1, 1]} : vector<16x384xbf16> to vector<16x128xbf16>
    %59 = vector.shape_cast %58 : vector<16x128xbf16> to vector<2x8x128xbf16>
    %60 = vector.extract_strided_slice %54 {offsets = [0, 128], sizes = [16, 128], strides = [1, 1]} : vector<16x384xbf16> to vector<16x128xbf16>
    %61 = vector.shape_cast %60 : vector<16x128xbf16> to vector<2x8x128xbf16>
    %62 = vector.extract_strided_slice %54 {offsets = [0, 256], sizes = [16, 128], strides = [1, 1]} : vector<16x384xbf16> to vector<16x128xbf16>
    %63 = vector.shape_cast %62 : vector<16x128xbf16> to vector<2x8x128xbf16>
    %64 = vector.extract_strided_slice %57 {offsets = [0, 0], sizes = [16, 128], strides = [1, 1]} : vector<16x256xbf16> to vector<16x128xbf16>
    %65 = vector.shape_cast %64 : vector<16x128xbf16> to vector<2x8x128xbf16>
    %66 = vector.extract_strided_slice %57 {offsets = [0, 128], sizes = [16, 128], strides = [1, 1]} : vector<16x256xbf16> to vector<16x128xbf16>
    %67 = vector.shape_cast %66 : vector<16x128xbf16> to vector<2x8x128xbf16>
    %68 = tpu.concatenate %61, %65 in 1 : vector<2x8x128xbf16>, vector<2x8x128xbf16> -> vector<2x16x128xbf16>
    %69 = tpu.concatenate %63, %67 in 1 : vector<2x8x128xbf16>, vector<2x8x128xbf16> -> vector<2x16x128xbf16>
    %70 = vector.extract_strided_slice %59 {offsets = [0, 0, 0], sizes = [2, 8, 32], strides = [1, 1, 1]} : vector<2x8x128xbf16> to vector<2x8x32xbf16>
    %71 = vector.extract_strided_slice %59 {offsets = [0, 0, 32], sizes = [2, 8, 32], strides = [1, 1, 1]} : vector<2x8x128xbf16> to vector<2x8x32xbf16>
    %72 = vector.extract_strided_slice %59 {offsets = [0, 0, 64], sizes = [2, 8, 32], strides = [1, 1, 1]} : vector<2x8x128xbf16> to vector<2x8x32xbf16>
    %73 = vector.extract_strided_slice %59 {offsets = [0, 0, 96], sizes = [2, 8, 32], strides = [1, 1, 1]} : vector<2x8x128xbf16> to vector<2x8x32xbf16>
    %74 = tpu.concatenate %70, %71, %72, %73 in 0 : vector<2x8x32xbf16>, vector<2x8x32xbf16>, vector<2x8x32xbf16>, vector<2x8x32xbf16> -> vector<8x8x32xbf16>
    %75 = vector.extract_strided_slice %68 {offsets = [0, 0, 0], sizes = [2, 16, 32], strides = [1, 1, 1]} : vector<2x16x128xbf16> to vector<2x16x32xbf16>
    %76 = vector.extract_strided_slice %68 {offsets = [0, 0, 32], sizes = [2, 16, 32], strides = [1, 1, 1]} : vector<2x16x128xbf16> to vector<2x16x32xbf16>
    %77 = vector.extract_strided_slice %68 {offsets = [0, 0, 64], sizes = [2, 16, 32], strides = [1, 1, 1]} : vector<2x16x128xbf16> to vector<2x16x32xbf16>
    %78 = vector.extract_strided_slice %68 {offsets = [0, 0, 96], sizes = [2, 16, 32], strides = [1, 1, 1]} : vector<2x16x128xbf16> to vector<2x16x32xbf16>
    %79 = tpu.concatenate %75, %76, %77, %78 in 0 : vector<2x16x32xbf16>, vector<2x16x32xbf16>, vector<2x16x32xbf16>, vector<2x16x32xbf16> -> vector<8x16x32xbf16>
    %80 = vector.extract_strided_slice %69 {offsets = [0, 0, 0], sizes = [2, 16, 32], strides = [1, 1, 1]} : vector<2x16x128xbf16> to vector<2x16x32xbf16>
    %81 = vector.extract_strided_slice %69 {offsets = [0, 0, 32], sizes = [2, 16, 32], strides = [1, 1, 1]} : vector<2x16x128xbf16> to vector<2x16x32xbf16>
    %82 = vector.extract_strided_slice %69 {offsets = [0, 0, 64], sizes = [2, 16, 32], strides = [1, 1, 1]} : vector<2x16x128xbf16> to vector<2x16x32xbf16>
    %83 = vector.extract_strided_slice %69 {offsets = [0, 0, 96], sizes = [2, 16, 32], strides = [1, 1, 1]} : vector<2x16x128xbf16> to vector<2x16x32xbf16>
    %84 = tpu.concatenate %80, %81, %82, %83 in 0 : vector<2x16x32xbf16>, vector<2x16x32xbf16>, vector<2x16x32xbf16>, vector<2x16x32xbf16> -> vector<8x16x32xbf16>
    "tpu.trace_start"() <{level = 10 : i32, message = "bqd,bkd->bqk"}> : () -> ()
    %cst_33 = arith.constant dense<0.000000e+00> : vector<8x8x16xf32>
    %85 = tpu.matmul %74, %79, %cst_33 {dimension_numbers = #tpu.dot_dimension_numbers<[2], [2], [1], [1], [0, 0, 0, 1, 1, 1], [0], [0]>} : vector<8x8x32xbf16>, vector<8x16x32xbf16>, vector<8x8x16xf32> -> vector<8x8x16xf32>
    "tpu.trace_stop"() : () -> ()
    %cst_34 = arith.constant 0.176776692 : f32
    %86 = vector.broadcast %cst_34 : f32 to vector<8x8x16xf32>
    %87 = arith.mulf %85, %86 : vector<8x8x16xf32>
    %88 = vector.broadcast %50 : vector<8x1x16xf32> to vector<8x8x16xf32>
    %89 = arith.addf %87, %88 : vector<8x8x16xf32>
    %cst_35 = arith.constant dense<0xFF800000> : vector<8x8xf32>
    %90 = vector.multi_reduction <maximumf>, %89, %cst_35 [2] : vector<8x8x16xf32> to vector<8x8xf32>
    %91 = vector.shape_cast %90 : vector<8x8xf32> to vector<8x8x1xf32>
    %92 = vector.broadcast %91 : vector<8x8x1xf32> to vector<8x8x16xf32>
    %93 = arith.subf %89, %92 : vector<8x8x16xf32>
    %94 = math.exp %93 : vector<8x8x16xf32>
    %cst_36 = arith.constant dense<0.000000e+00> : vector<8x8xf32>
    %95 = vector.multi_reduction <add>, %94, %cst_36 [2] : vector<8x8x16xf32> to vector<8x8xf32>
    %96 = vector.shape_cast %95 : vector<8x8xf32> to vector<8x8x1xf32>
    %97 = tpu.reciprocal %96 {approx = true} : vector<8x8x1xf32> -> vector<8x8x1xf32>
    %98 = vector.broadcast %97 : vector<8x8x1xf32> to vector<8x8x16xf32>
    %99 = arith.mulf %94, %98 : vector<8x8x16xf32>
    %100 = arith.truncf %99 : vector<8x8x16xf32> to vector<8x8x16xbf16>
    "tpu.trace_start"() <{level = 10 : i32, message = "bqk,bkd->bqd"}> : () -> ()
    %cst_37 = arith.constant dense<0.000000e+00> : vector<8x8x32xf32>
    %101 = tpu.matmul %100, %84, %cst_37 {dimension_numbers = #tpu.dot_dimension_numbers<[2], [1], [1], [2], [0, 0, 0, 1, 1, 2], [0], [0]>} : vector<8x8x16xbf16>, vector<8x16x32xbf16>, vector<8x8x32xf32> -> vector<8x8x32xf32>
    "tpu.trace_stop"() : () -> ()
    %102 = vector.extract_strided_slice %101 {offsets = [0, 0, 0], sizes = [2, 8, 32], strides = [1, 1, 1]} : vector<8x8x32xf32> to vector<2x8x32xf32>
    %103 = vector.shape_cast %102 : vector<2x8x32xf32> to vector<16x32xf32>
    %104 = arith.truncf %103 : vector<16x32xf32> to vector<16x32xbf16>
    %c0_38 = arith.constant 0 : index
    %c0_39 = arith.constant 0 : index
    %105 = vector.load %arg7[%c0_38, %c0_39] : memref<16x128xbf16, #tpu.memory_space<vmem>>, vector<16x32xbf16>
    tpu.vector_store %arg7[%c0_38, %c0_39], %104 {strides = array<i32>} : memref<16x128xbf16, #tpu.memory_space<vmem>>, vector<16x32xbf16>,
    %106 = vector.extract_strided_slice %101 {offsets = [2, 0, 0], sizes = [2, 8, 32], strides = [1, 1, 1]} : vector<8x8x32xf32> to vector<2x8x32xf32>
    %107 = vector.shape_cast %106 : vector<2x8x32xf32> to vector<16x32xf32>
    %108 = arith.truncf %107 : vector<16x32xf32> to vector<16x32xbf16>
    %c0_40 = arith.constant 0 : index
    %c32 = arith.constant 32 : index
    %109 = vector.load %arg7[%c0_40, %c32] : memref<16x128xbf16, #tpu.memory_space<vmem>>, vector<16x32xbf16>
    tpu.vector_store %arg7[%c0_40, %c32], %108 {strides = array<i32>} : memref<16x128xbf16, #tpu.memory_space<vmem>>, vector<16x32xbf16>,
    %110 = vector.extract_strided_slice %101 {offsets = [4, 0, 0], sizes = [2, 8, 32], strides = [1, 1, 1]} : vector<8x8x32xf32> to vector<2x8x32xf32>
    %111 = vector.shape_cast %110 : vector<2x8x32xf32> to vector<16x32xf32>
    %112 = arith.truncf %111 : vector<16x32xf32> to vector<16x32xbf16>
    %c0_41 = arith.constant 0 : index
    %c64 = arith.constant 64 : index
    %113 = vector.load %arg7[%c0_41, %c64] : memref<16x128xbf16, #tpu.memory_space<vmem>>, vector<16x32xbf16>
    tpu.vector_store %arg7[%c0_41, %c64], %112 {strides = array<i32>} : memref<16x128xbf16, #tpu.memory_space<vmem>>, vector<16x32xbf16>,
    %114 = vector.extract_strided_slice %101 {offsets = [6, 0, 0], sizes = [2, 8, 32], strides = [1, 1, 1]} : vector<8x8x32xf32> to vector<2x8x32xf32>
    %115 = vector.shape_cast %114 : vector<2x8x32xf32> to vector<16x32xf32>
    %116 = arith.truncf %115 : vector<16x32xf32> to vector<16x32xbf16>
    %c0_42 = arith.constant 0 : index
    %c96 = arith.constant 96 : index
    %117 = vector.load %arg7[%c0_42, %c96] : memref<16x128xbf16, #tpu.memory_space<vmem>>, vector<16x32xbf16>
    tpu.vector_store %arg7[%c0_42, %c96], %116 {strides = array<i32>} : memref<16x128xbf16, #tpu.memory_space<vmem>>, vector<16x32xbf16>,
    %c0_43 = arith.constant 0 : index
    %c0_44 = arith.constant 0 : index
    %118 = vector.load %arg7[%c0_43, %c0_44] : memref<16x128xbf16, #tpu.memory_space<vmem>>, vector<16x128xbf16>
    %c0_45 = arith.constant 0 : index
    %c768 = arith.constant 768 : index
    %119 = vector.load %arg3[%c0_45, %c768] : memref<128x1152xbf16, #tpu.memory_space<vmem>>, vector<128x128xbf16>
    %cst_46 = arith.constant dense<0.000000e+00> : vector<16x128xf32>
    %120 = tpu.matmul %118, %119, %cst_46 {dimension_numbers = #tpu.dot_dimension_numbers<[1], [0], [0], [1], [0, 0, 1, 1], [], []>} : vector<16x128xbf16>, vector<128x128xbf16>, vector<16x128xf32> -> vector<16x128xf32>
    %121 = arith.addf %39, %120 : vector<16x128xf32>
    %cst_47 = arith.constant dense<0.000000e+00> : vector<16xf32>
    %122 = vector.multi_reduction <add>, %121, %cst_47 [1] : vector<16x128xf32> to vector<16xf32>
    %123 = vector.shape_cast %122 : vector<16xf32> to vector<16x1xf32>
    %cst_48 = arith.constant 1.280000e+02 : f32
    %124 = vector.broadcast %cst_48 : f32 to vector<16x1xf32>
    %125 = arith.divf %123, %124 : vector<16x1xf32>
    %126 = vector.broadcast %125 : vector<16x1xf32> to vector<16x128xf32>
    %127 = arith.subf %121, %126 : vector<16x128xf32>
    %128 = arith.mulf %127, %127 : vector<16x128xf32>
    %cst_49 = arith.constant dense<0.000000e+00> : vector<16xf32>
    %129 = vector.multi_reduction <add>, %128, %cst_49 [1] : vector<16x128xf32> to vector<16xf32>
    %130 = vector.shape_cast %129 : vector<16xf32> to vector<16x1xf32>
    %cst_50 = arith.constant 1.280000e+02 : f32
    %131 = vector.broadcast %cst_50 : f32 to vector<16x1xf32>
    %132 = arith.divf %130, %131 : vector<16x1xf32>
    %133 = vector.broadcast %125 : vector<16x1xf32> to vector<16x128xf32>
    %134 = arith.subf %121, %133 : vector<16x128xf32>
    %cst_51 = arith.constant 9.99999974E-6 : f32
    %135 = vector.broadcast %cst_51 : f32 to vector<16x1xf32>
    %136 = arith.addf %132, %135 : vector<16x1xf32>
    %137 = math.rsqrt %136 : vector<16x1xf32>
    %138 = vector.broadcast %137 : vector<16x1xf32> to vector<16x128xf32>
    %139 = arith.mulf %134, %138 : vector<16x128xf32>
    %140 = vector.broadcast %6 : vector<1x128xf32> to vector<16x128xf32>
    %141 = arith.mulf %139, %140 : vector<16x128xf32>
    %142 = vector.broadcast %7 : vector<1x128xf32> to vector<16x128xf32>
    %143 = arith.addf %141, %142 : vector<16x128xf32>
    %144 = arith.truncf %143 : vector<16x128xf32> to vector<16x128xbf16>
    %c0_52 = arith.constant 0 : index
    %c896 = arith.constant 896 : index
    %145 = vector.load %arg3[%c0_52, %c896] : memref<128x1152xbf16, #tpu.memory_space<vmem>>, vector<128x256xbf16>
    %cst_53 = arith.constant dense<0.000000e+00> : vector<16x256xf32>
    %146 = tpu.matmul %144, %145, %cst_53 {dimension_numbers = #tpu.dot_dimension_numbers<[1], [0], [0], [1], [0, 0, 1, 1], [], []>} : vector<16x128xbf16>, vector<128x256xbf16>, vector<16x256xf32> -> vector<16x256xf32>
    %147 = vector.broadcast %11 : vector<1x256xf32> to vector<16x256xf32>
    %148 = arith.addf %146, %147 : vector<16x256xf32>
    %cst_54 = arith.constant 0.000000e+00 : f32
    %149 = vector.broadcast %cst_54 : f32 to vector<16x256xf32>
    %150 = arith.maximumf %148, %149 : vector<16x256xf32>
    %151 = arith.truncf %150 : vector<16x256xf32> to vector<16x256xbf16>
    %c0_55 = arith.constant 0 : index
    %c0_56 = arith.constant 0 : index
    %152 = vector.load %arg4[%c0_55, %c0_56] : memref<256x128xbf16, #tpu.memory_space<vmem>>, vector<256x128xbf16>
    %cst_57 = arith.constant dense<0.000000e+00> : vector<16x128xf32>
    %153 = tpu.matmul %151, %152, %cst_57 {dimension_numbers = #tpu.dot_dimension_numbers<[1], [0], [0], [1], [0, 0, 1, 1], [], []>} : vector<16x256xbf16>, vector<256x128xbf16>, vector<16x128xf32> -> vector<16x128xf32>
    %154 = vector.broadcast %10 : vector<1x128xf32> to vector<16x128xf32>
    %155 = arith.addf %153, %154 : vector<16x128xf32>
    %156 = arith.addf %143, %155 : vector<16x128xf32>
    %cst_58 = arith.constant dense<0.000000e+00> : vector<16xf32>
    %157 = vector.multi_reduction <add>, %156, %cst_58 [1] : vector<16x128xf32> to vector<16xf32>
    %158 = vector.shape_cast %157 : vector<16xf32> to vector<16x1xf32>
    %cst_59 = arith.constant 1.280000e+02 : f32
    %159 = vector.broadcast %cst_59 : f32 to vector<16x1xf32>
    %160 = arith.divf %158, %159 : vector<16x1xf32>
    %161 = vector.broadcast %160 : vector<16x1xf32> to vector<16x128xf32>
    %162 = arith.subf %156, %161 : vector<16x128xf32>
    %163 = arith.mulf %162, %162 : vector<16x128xf32>
    %cst_60 = arith.constant dense<0.000000e+00> : vector<16xf32>
    %164 = vector.multi_reduction <add>, %163, %cst_60 [1] : vector<16x128xf32> to vector<16xf32>
    %165 = vector.shape_cast %164 : vector<16xf32> to vector<16x1xf32>
    %cst_61 = arith.constant 1.280000e+02 : f32
    %166 = vector.broadcast %cst_61 : f32 to vector<16x1xf32>
    %167 = arith.divf %165, %166 : vector<16x1xf32>
    %168 = vector.broadcast %160 : vector<16x1xf32> to vector<16x128xf32>
    %169 = arith.subf %156, %168 : vector<16x128xf32>
    %cst_62 = arith.constant 9.99999974E-6 : f32
    %170 = vector.broadcast %cst_62 : f32 to vector<16x1xf32>
    %171 = arith.addf %167, %170 : vector<16x1xf32>
    %172 = math.rsqrt %171 : vector<16x1xf32>
    %173 = vector.broadcast %172 : vector<16x1xf32> to vector<16x128xf32>
    %174 = arith.mulf %169, %173 : vector<16x128xf32>
    %175 = vector.broadcast %8 : vector<1x128xf32> to vector<16x128xf32>
    %176 = arith.mulf %174, %175 : vector<16x128xf32>
    %177 = vector.broadcast %9 : vector<1x128xf32> to vector<16x128xf32>
    %178 = arith.addf %176, %177 : vector<16x128xf32>
    %179 = vector.shape_cast %178 : vector<16x128xf32> to vector<2x8x128xf32>
    %c0_63 = arith.constant 0 : index
    %c0_64 = arith.constant 0 : index
    %c0_65 = arith.constant 0 : index
    %180 = vector.load %arg6[%c0_63, %c0_64, %c0_65] : memref<2x8x128xf32, #tpu.memory_space<vmem>>, vector<2x8x128xf32>
    tpu.vector_store %arg6[%c0_63, %c0_64, %c0_65], %179 {strides = array<i32>} : memref<2x8x128xf32, #tpu.memory_space<vmem>>, vector<2x8x128xf32>,
    return
  }
  func.func @transform_0(%arg0: i32) -> (i32, i32, i32) {
    %c0_i32 = arith.constant 0 : i32
    %c0_i32_0 = arith.constant 0 : i32
    %c0_i32_1 = arith.constant 0 : i32
    return %arg0, %c0_i32, %c0_i32_0 : i32, i32, i32
  }
  func.func @transform_1(%arg0: i32) -> (i32, i32) {
    %c0_i32 = arith.constant 0 : i32
    %c0_i32_0 = arith.constant 0 : i32
    return %arg0, %c0_i32 : i32, i32
  }
  func.func @transform_2(%arg0: i32) -> (i32, i32) {
    %c0_i32 = arith.constant 0 : i32
    %c0_i32_0 = arith.constant 0 : i32
    %c0_i32_1 = arith.constant 0 : i32
    return %c0_i32, %c0_i32_0 : i32, i32
  }
  func.func @transform_3(%arg0: i32) -> (i32, i32) {
    %c0_i32 = arith.constant 0 : i32
    %c0_i32_0 = arith.constant 0 : i32
    %c0_i32_1 = arith.constant 0 : i32
    return %c0_i32, %c0_i32_0 : i32, i32
  }
  func.func @transform_4(%arg0: i32) -> (i32, i32) {
    %c0_i32 = arith.constant 0 : i32
    %c0_i32_0 = arith.constant 0 : i32
    %c0_i32_1 = arith.constant 0 : i32
    return %c0_i32, %c0_i32_0 : i32, i32
  }
  func.func @transform_5(%arg0: i32) -> (i32, i32, i32) {
    %c0_i32 = arith.constant 0 : i32
    %c0_i32_0 = arith.constant 0 : i32
    %c0_i32_1 = arith.constant 0 : i32
    return %arg0, %c0_i32, %c0_i32_0 : i32, i32, i32
  }
}

</mosaic_0001>

<bundles_post_ra>
// kernel: tpu_custom_call.1
= control target key start
LH: loop header
LB: loop body
LE: loop exit
PB: predicated region body
PF: predicated region fallthrough
CT: control target
= control target key end

     0   :  { %10 = vsyncpa [#allocation4], 0  ;;  %s3251_s0 = inlined_call_operand.hbm [shape: bf16[2,8,128], index: 0, kind: input, shape index: {}]   ;;  %s3252_s1 = inlined_call_operand.hbm [shape: bf16[16,128], index: 1, kind: input, shape index: {}]   ;;  %s3253_s2 = inlined_call_operand.hbm [shape: bf16[128,1152], index: 2, kind: input, shape index: {}]   ;;  %s3254_s3 = inlined_call_operand.hbm [shape: bf16[256,128], index: 3, kind: input, shape index: {}]   ;;  %s3255_s4 = inlined_call_operand.hbm [shape: f32[9,256], index: 4, kind: input, shape index: {}]   ;;  %s3256_s5 = inlined_call_operand.hbm [shape: f32[2,8,128], index: 5, kind: output, shape index: {}]  }
   0x1   :  { %11 = vsyncpa [#allocation7], 0 }
   0x2   :  { %12 = vsyncpa [#allocation10], 0 }
   0x3   :  { %13 = vsyncpa [#allocation5], 0  ;;  %s2877_s18 = smov [#allocation6]   ;;  %s2878_s20 = smov [#allocation9]  }
   0x4   :  { %s31_s19 = sshll.u32 %s2877_s18, 4  ;;  %s55_s21 = sshll.u32 %s2878_s20, 4  ;;  %s32_s19 = int_to_ptr.vmem [resolvable:$true] %s31_s19  ;;  %s2927_s21 = int_to_ptr.vmem [resolvable:$true] %s55_s21 }
   0x5   :  { %s2737_s24 = scalar_lea.hbm %s3252_s1, 128 }
   0x6   :  { %p2738_p0 = scmp.ne.s32.totalorder %s3252_s1, %s2737_s24  ;;  %p2741_p1 = scmp.lt.u32.totalorder %s2737_s24, %s3252_s1 }
   0x8   :  { %p2743_p2 = pnand %p2741_p1, %p2738_p0 }
   0xa   :  { %2746 = shalt.err (!%p2743_p2)
}
   0xb   :  { %s2747_s29 = scalar_lea.vmem %s32_s19, 128  ;;  %p2752_p4 = scmp.lt.s32.totalorder %s32_s19, %s32_s19 }
   0xc   :  { %p2748_p3 = scmp.ne.s32.totalorder %s32_s19, %s2747_s29  ;;  %p2753_p5 = scmp.lt.s32.totalorder %s2747_s29, %s2747_s29 }
   0xe   :  { %p2754_p6 = por %p2753_p5, %p2752_p4 }
  0x10   :  { %p2755_p7 = pnand %p2754_p6, %p2748_p3 }
  0x12   :  { %2758 = shalt.err (!%p2755_p7)
}
  0x13   :  { %s2879_s30 = smov 64   ;;  %s2880_s6 = smov 4  }
  0x14   :  { %37 = dma.hbm_to_vmem [thread:$0]  %s3252_s1, 128, %s32_s19, [#allocation7], %s2879_s30, %s2879_s30, %s2880_s6  }
  0x15   :  { %s2759_s11 = scalar_lea.hbm %s3254_s3, 2048 }
  0x16   :  { %p2760_p8 = scmp.ne.s32.totalorder %s3254_s3, %s2759_s11  ;;  %p2763_p9 = scmp.lt.u32.totalorder %s2759_s11, %s3254_s3 }
  0x18   :  { %p2765_p10 = pnand %p2763_p9, %p2760_p8 }
  0x1a   :  { %2768 = shalt.err (!%p2765_p10)
}
  0x1b   :  { %s2769_s16 = scalar_lea.vmem %s2927_s21, 2048  ;;  %p2774_p12 = scmp.lt.s32.totalorder %s2927_s21, %s2927_s21 }
  0x1c   :  { %p2770_p11 = scmp.ne.s32.totalorder %s2927_s21, %s2769_s16  ;;  %p2775_p13 = scmp.lt.s32.totalorder %s2769_s16, %s2769_s16 }
  0x1e   :  { %p2776_p0 = por %p2775_p13, %p2774_p12 }
  0x20   :  { %p2777_p1 = pnand %p2776_p0, %p2770_p11 }
  0x22   :  { %2780 = shalt.err (!%p2777_p1)
}
  0x23   :  { %61 = dma.hbm_to_vmem [thread:$0]  %s3254_s3, 2048, %s2927_s21, [#allocation10], %s2879_s30, %s2879_s30, %s2880_s6  }
  0x24   :  { %s2881_s18 = smov [#allocation3]   ;;  %s2882_s20 = smov [#allocation8]  }
  0x25   :  { %s19_s19 = sshll.u32 %s2881_s18, 4  ;;  %s43_s22 = sshll.u32 %s2882_s20, 4  ;;  %s20_s19 = int_to_ptr.vmem [resolvable:$true] %s19_s19  ;;  %s2964_s22 = int_to_ptr.vmem [resolvable:$true] %s43_s22 }
  0x26   :  { %s2781_s25 = scalar_lea.hbm %s3251_s0, 128 }
  0x27   :  { %p2782_p2 = scmp.ne.s32.totalorder %s3251_s0, %s2781_s25  ;;  %p2785_p3 = scmp.lt.u32.totalorder %s2781_s25, %s3251_s0 }
  0x29   :  { %p2787_p4 = pnand %p2785_p3, %p2782_p2 }
  0x2b   :  { %2790 = shalt.err (!%p2787_p4)
}
  0x2c   :  { %s2791_s3 = scalar_lea.vmem %s20_s19, 128  ;;  %p2796_p6 = scmp.lt.s32.totalorder %s20_s19, %s20_s19 }
  0x2d   :  { %p2792_p5 = scmp.ne.s32.totalorder %s20_s19, %s2791_s3  ;;  %p2797_p7 = scmp.lt.s32.totalorder %s2791_s3, %s2791_s3 }
  0x2f   :  { %p2798_p8 = por %p2797_p7, %p2796_p6 }
  0x31   :  { %p2799_p9 = pnand %p2798_p8, %p2792_p5 }
  0x33   :  { %2802 = shalt.err (!%p2799_p9)
}
  0x34   :  { %25 = dma.hbm_to_vmem [thread:$0]  %s3251_s0, 128, %s20_s19, [#allocation4], %s2879_s30, %s2879_s30, %s2880_s6  }
  0x35   :  { %s2803_s10 = scalar_lea.hbm %s3253_s2, 9216 }
  0x36   :  { %p2804_p10 = scmp.ne.s32.totalorder %s3253_s2, %s2803_s10  ;;  %p2807_p11 = scmp.lt.u32.totalorder %s2803_s10, %s3253_s2 }
  0x38   :  { %p2809_p12 = pnand %p2807_p11, %p2804_p10 }
  0x3a   :  { %2812 = shalt.err (!%p2809_p12)
}
  0x3b   :  { %s2813_s15 = scalar_lea.vmem %s2964_s22, 9216  ;;  %p2818_p0 = scmp.lt.s32.totalorder %s2964_s22, %s2964_s22 }
  0x3c   :  { %p2814_p13 = scmp.ne.s32.totalorder %s2964_s22, %s2813_s15  ;;  %p2819_p1 = scmp.lt.s32.totalorder %s2813_s15, %s2813_s15 }
  0x3e   :  { %p2820_p2 = por %p2819_p1, %p2818_p0 }
  0x40   :  { %p2821_p3 = pnand %p2820_p2, %p2814_p13 }
  0x42   :  { %2824 = shalt.err (!%p2821_p3)
}
  0x43   :  { %s2883_s0 = smov 576   ;;  %s2884_s6 = smov 36  }
  0x44   :  { %49 = dma.hbm_to_vmem [thread:$0]  %s3253_s2, 9216, %s2964_s22, [#allocation7], %s2883_s0, %s2883_s0, %s2884_s6  }
  0x45   :  { %s2885_s17 = smov [#allocation11]   ;;  %s2825_s23 = scalar_lea.hbm %s3255_s4, 512 }
  0x46   :  { %s67_s18 = sshll.u32 %s2885_s17, 4  ;;  %p2826_p4 = scmp.ne.s32.totalorder %s3255_s4, %s2825_s23  ;;  %s68_s18 = int_to_ptr.vmem [resolvable:$true] %s67_s18 }
  0x47   :  { %p2829_p5 = scmp.lt.u32.totalorder %s2825_s23, %s3255_s4 }
  0x49   :  { %p2831_p6 = pnand %p2829_p5, %p2826_p4 }
  0x4b   :  { %2834 = shalt.err (!%p2831_p6)
}
  0x4c   :  { %s2835_s28 = scalar_lea.vmem %s68_s18, 512  ;;  %p2840_p8 = scmp.lt.s32.totalorder %s68_s18, %s68_s18 }
  0x4d   :  { %p2836_p7 = scmp.ne.s32.totalorder %s68_s18, %s2835_s28  ;;  %p2841_p9 = scmp.lt.s32.totalorder %s2835_s28, %s2835_s28 }
  0x4f   :  { %p2842_p10 = por %p2841_p9, %p2840_p8 }
  0x51   :  { %p2843_p11 = pnand %p2842_p10, %p2836_p7 }
  0x53   :  { %2846 = shalt.err (!%p2843_p11)
}
  0x54   :  { %s2886_s2 = smov 256   ;;  %s2887_s22 = smov 16  }
  0x55   :  { %73 = dma.hbm_to_vmem [thread:$0]  %s3255_s4, 512, %s68_s18, [#allocation10], %s2886_s2, %s2886_s2, %s2887_s22  }
  0x56   :  { %2869 = dma.done.wait [#allocation4], 128  }
  0x57   :  { %2870 = vsyncadd [#allocation4], 4294967168 }
  0x58   :  { %2871 = dma.done.wait [#allocation7], 9344  }
  0x59   :  { %2872 = vsyncadd [#allocation7], 4294957952 }
  0x5a   :  { %2873 = dma.done.wait [#allocation10], 2560  }
  0x5b   :  { %2874 = vsyncadd [#allocation10], 4294964736  ;;  %v2888_v0 = vmov 0.0   ;;  %vm2889_vm0 = vmmov 0   ;;  %v2579_v1 = vld [vmem:[#allocation8] ss:$36 sps:$4 sm:$0xff]  }
  0x5c   :  { %2391 = vmatprep.subr.bf16.mxu0 %v2888_v0  ;;  %2407 = vmatprep.mubr.msk.bf16.mxu0 %vm2889_vm0, %v2888_v0  ;;  %v2580_v2 = vld [vmem:[#allocation8 + $0x48] ss:$36 sps:$4 sm:$0xff]   ;;  %v2581_v3 = vld [vmem:[#allocation8 + $0x90] ss:$36 sps:$4 sm:$0xff]   ;;  %v2582_v4 = vld [vmem:[#allocation8 + $0xd8] ss:$36 sps:$4 sm:$0xff]  }
  0x5d   :  { %2411 = vmatprep.subr.bf16.mxu1 %v2888_v0  ;;  %2413 = vmatprep.mubr.msk.bf16.mxu1 %vm2889_vm0, %v2888_v0  ;;  %v91_v5 = vld [vmem:[#allocation3] sm:$0xf]  ;;  %v2583_v6 = vld [vmem:[#allocation8 + $0x120] ss:$36 sps:$4 sm:$0xff]   ;;  %v2584_v7 = vld [vmem:[#allocation8 + $0x168] ss:$36 sps:$4 sm:$0xff]  }
  0x5e   :  { %2392 = vmatpush3.bf16.msra.mxu0 %v2579_v1  ;;  %2412 = vmatpush3.bf16.xpose.msra.mxu1 %v91_v5  ;;  %v2585_v8 = vld [vmem:[#allocation8 + $0x1b0] ss:$36 sps:$4 sm:$0xff]   ;;  %v2586_v9 = vld [vmem:[#allocation8 + $0x1f8] ss:$36 sps:$4 sm:$0xff]   ;;  %v95_v12 = vld [vmem:[#allocation11] ss:$0 sm:$0xff] }
  0x5f   :  { %2393 = vmatprep.subr.bf16.mxu0 %v2888_v0  ;;  %2417 = vmatprep.subr.bf16.mxu1 %v2888_v0  ;;  %v92_v10 = vld [vmem:[#allocation3 + $0x4] sm:$0xf]  ;;  %v2590_v21 = vld [vmem:[#allocation8 + $0x8] ss:$36 sps:$4 sm:$0xff]   ;;  %v2890_v22 = vmov 1065369472  }
  0x60   :  { %v2180_v11 = vcombine.low %v91_v5, %v92_v10  ;;  %v2591_v23 = vld [vmem:[#allocation8 + $0xc] ss:$36 sps:$4 sm:$0xff]   ;;  %v2588_v24 = vld [vmem:[#allocation8 + $0x4] ss:$36 sps:$4 sm:$0xff]   ;;  %v2595_v35 = vld [vmem:[#allocation8 + $0x54] ss:$36 sps:$4 sm:$0xff]  }
  0x61   :  { %v2594_v25 = vld [vmem:[#allocation8 + $0x50] ss:$36 sps:$4 sm:$0xff]   ;;  %v2598_v36 = vld [vmem:[#allocation8 + $0x98] ss:$36 sps:$4 sm:$0xff]   ;;  %v2602_v39 = vld [vmem:[#allocation8 + $0xe0] ss:$36 sps:$4 sm:$0xff]  }
  0x62   :  { %2394 = vmatpush3.bf16.msra.mxu0 %v2580_v2  ;;  %v2592_v26 = vld [vmem:[#allocation8 + $0x4c] ss:$36 sps:$4 sm:$0xff]   ;;  %v2596_v37 = vld [vmem:[#allocation8 + $0x94] ss:$36 sps:$4 sm:$0xff]   ;;  %v2599_v38 = vld [vmem:[#allocation8 + $0x9c] ss:$36 sps:$4 sm:$0xff]  }
  0x63   :  { %2395 = vmatprep.subr.bf16.mxu0 %v2888_v0  ;;  %v2600_v40 = vld [vmem:[#allocation8 + $0xdc] ss:$36 sps:$4 sm:$0xff]   ;;  %v2603_v41 = vld [vmem:[#allocation8 + $0xe4] ss:$36 sps:$4 sm:$0xff]   ;;  %v2607_v44 = vld [vmem:[#allocation8 + $0x12c] ss:$36 sps:$4 sm:$0xff]  }
  0x64   :  { %v2606_v42 = vld [vmem:[#allocation8 + $0x128] ss:$36 sps:$4 sm:$0xff]   ;;  %v2610_v45 = vld [vmem:[#allocation8 + $0x170] ss:$36 sps:$4 sm:$0xff]   ;;  %v2614_v48 = vld [vmem:[#allocation8 + $0x1b8] ss:$36 sps:$4 sm:$0xff]  }
  0x65   :  { %2414 = vmatmul.mubr.bf16.vlgmr.msra.gmra.mrb[0].mxu1 %v2890_v22  ;;  %v2604_v43 = vld [vmem:[#allocation8 + $0x124] ss:$36 sps:$4 sm:$0xff]   ;;  %v2608_v46 = vld [vmem:[#allocation8 + $0x16c] ss:$36 sps:$4 sm:$0xff]   ;;  %v2611_v47 = vld [vmem:[#allocation8 + $0x174] ss:$36 sps:$4 sm:$0xff]  }
  0x66   :  { %2396 = vmatpush3.bf16.msra.mxu0 %v2581_v3  ;;  %2418 = vmatpush3.bf16.xpose.msra.mxu1 %v92_v10  ;;  %v2612_v49 = vld [vmem:[#allocation8 + $0x1b4] ss:$36 sps:$4 sm:$0xff]   ;;  %v2615_v50 = vld [vmem:[#allocation8 + $0x1bc] ss:$36 sps:$4 sm:$0xff]   ;;  %v2619_v53 = vld [vmem:[#allocation8 + $0x204] ss:$36 sps:$4 sm:$0xff]  }
  0x67   :  { %2397 = vmatprep.subr.bf16.mxu0 %v2888_v0  ;;  %2419 = vmatprep.mubr.msk.bf16.mxu1 %vm2889_vm0, %v2888_v0  ;;  %v2616_v51 = vld [vmem:[#allocation8 + $0x1fc] ss:$36 sps:$4 sm:$0xff]   ;;  %v2622_v54 = vld [vmem:[#allocation8 + $0x14] ss:$36 sps:$4 sm:$0xff]   ;;  %v2891_v55 = vmov 0   ;;  %s2892_s4 = smov 96  }
  0x68   :  { %496 = vmatprep.subr.bf16.mxu1 %v2590_v21  ;;  %v2618_v52 = vld [vmem:[#allocation8 + $0x200] ss:$36 sps:$4 sm:$0xff]   ;;  %vm753_vm1 = vcmask 1043456   ;;  %vm816_vm2 = vcmask 261120   ;;  %s2893_s21 = smov 32   ;;  %vm329_vm4 = vcmask 64512  }
  0x69   :  { %v2628_v21 = vld [vmem:[#allocation8 + $0xa4] ss:$36 sps:$4 sm:$0xff]   ;;  %vm332_vm5 = vcmask 72704   ;;  %vm1207_vm7 = vcmask 130048   ;;  %vm1655_vm8 = vcmask 523520   ;;  %vm1662_vm9 = vcmask 785920  }
  0x6a   :  { %2398 = vmatpush3.bf16.msra.mxu0 %v2582_v4  ;;  %vm1669_vm10 = vcmask 1048320  }
  0x6b   :  { %2399 = vmatprep.subr.bf16.mxu0 %v2888_v0 }
  0x6d   :  { %2420 = vmatmul.mubr.bf16.vlgmr.msra.gmra.mrb[4].mxu1 %v2890_v22  ;;  %v2626_v22 = vld [vmem:[#allocation8 + $0xa0] ss:$36 sps:$4 sm:$0xff]  }
  0x6e   :  { %2400 = vmatpush3.bf16.msra.mxu0 %v2583_v6  ;;  %497 = vmatpush1.bf16.msra.mxu1 %v2588_v24  ;;  %v2629_v24 = vld [vmem:[#allocation8 + $0xe8] ss:$36 sps:$4 sm:$0xff]  }
  0x6f   :  { %2401 = vmatprep.subr.bf16.mxu0 %v2888_v0  ;;  %498 = vmatprep.subr.bf16.mxu1 %v2594_v25  ;;  %v2634_v25 = vld [vmem:[#allocation8 + $0x134] ss:$36 sps:$4 sm:$0xff]  }
  0x70   :  { %528 = vmatprep.mubr.bf16.mxu1 %v2891_v55 }
  0x72   :  { %2402 = vmatpush3.bf16.msra.mxu0 %v2584_v7  ;;  %499 = vmatpush1.bf16.msra.mxu1 %v2592_v26  ;;  %v2632_v26 = vld [vmem:[#allocation8 + $0x130] ss:$36 sps:$4 sm:$0xff]  }
  0x73   :  { %2403 = vmatprep.subr.bf16.mxu0 %v2888_v0  ;;  %500 = vmatprep.subr.bf16.mxu1 %v2598_v36 }
  0x76   :  { %2404 = vmatpush3.bf16.msra.mxu0 %v2585_v8  ;;  %501 = vmatpush1.bf16.msra.mxu1 %v2596_v37 }
  0x77   :  { %2405 = vmatprep.subr.bf16.mxu0 %v2888_v0  ;;  %502 = vmatprep.subr.bf16.mxu1 %v2602_v39 }
  0x7a   :  { %2406 = vmatpush3.bf16.msra.mxu0 %v2586_v9  ;;  %503 = vmatpush1.bf16.msra.mxu1 %v2600_v40  ;;  %v96_v9 = vld [vmem:[#allocation11 + $0x1] ss:$0 sm:$0xff] }
  0x7b   :  { %2423 = vmatprep.subr.bf16.mxu0 %v2888_v0  ;;  %504 = vmatprep.subr.bf16.mxu1 %v2606_v42 }
  0x7d   :  { %2408 = vmatmul.mubr.bf16.vlgmr.msra.gmra.mrb[0].mxu0 %v2180_v11 }
  0x7e   :  { %2439 = vmatprep.mubr.msk.bf16.mxu0 %vm2889_vm0, %v2888_v0  ;;  %2424 = vmatpush3.bf16.msra.mxu0 %v2591_v23  ;;  %v2631_v23 = vld [vmem:[#allocation8 + $0xec] ss:$36 sps:$4 sm:$0xff]  }
  0x7f   :  { %2425 = vmatprep.subr.bf16.mxu0 %v2888_v0  ;;  %505 = vmatpush1.bf16.msra.mxu1 %v2604_v43 }
  0x80   :  { %506 = vmatprep.subr.bf16.mxu1 %v2610_v45 }
  0x82   :  { %2426 = vmatpush3.bf16.msra.mxu0 %v2595_v35 }
  0x83   :  { %2427 = vmatprep.subr.bf16.mxu0 %v2888_v0  ;;  %507 = vmatpush1.bf16.msra.mxu1 %v2608_v46 }
  0x84   :  { %508 = vmatprep.subr.bf16.mxu1 %v2614_v48 }
  0x86   :  { %2428 = vmatpush3.bf16.msra.mxu0 %v2599_v38 }
  0x87   :  { %2429 = vmatprep.subr.bf16.mxu0 %v2888_v0  ;;  %509 = vmatpush1.bf16.msra.mxu1 %v2612_v49 }
  0x88   :  { %510 = vmatprep.subr.bf16.mxu1 %v2618_v52 }
  0x8a   :  { %2430 = vmatpush3.bf16.msra.mxu0 %v2603_v41 }
  0x8b   :  { %2431 = vmatprep.subr.bf16.mxu0 %v2888_v0  ;;  %511 = vmatpush1.bf16.msra.mxu1 %v2616_v51 }
  0x8c   :  { %685 = vmatprep.subr.bf16.mxu1 %v2622_v54 }
  0x8e   :  { %2432 = vmatpush3.bf16.msra.mxu0 %v2607_v44 }
  0x8f   :  { %2433 = vmatprep.subr.bf16.mxu0 %v2888_v0 }
  0x92   :  { %2434 = vmatpush3.bf16.msra.mxu0 %v2611_v47 }
  0x93   :  { %2435 = vmatprep.subr.bf16.mxu0 %v2888_v0 }
  0x96   :  { %2436 = vmatpush3.bf16.msra.mxu0 %v2615_v50 }
  0x97   :  { %2437 = vmatprep.subr.bf16.mxu0 %v2888_v0 }
  0x9a   :  { %2438 = vmatpush3.bf16.msra.mxu0 %v2619_v53 }
  0x9b   :  { %2455 = vmatprep.subr.bf16.mxu0 %v2888_v0 }
 0x138   :  { %v3046_v56 = vpop.f32.mrb[0].mxu1 }
 0x139   :  { %v2415_v57 = vpop.f32.mrb[1].mxu1  ;;  %vm325_vm3 = vcmp.eq.f32.partialorder %v3046_v56, 0.0 }
 0x13a   :  { %v282_v58 = vpop.f32.mrb[2].mxu1 }
 0x13b   :  { %v2416_v59 = vpop.f32.mrb[3].mxu1 }
 0x140   :  { %v3048_v60 = vpop.f32.mrb[4].mxu1 }
 0x141   :  { %v2421_v61 = vpop.f32.mrb[5].mxu1  ;;  %vm326_vm6 = vcmp.eq.f32.partialorder %v3048_v60, 0.0 }
 0x142   :  { %v322_v62 = vpop.f32.mrb[6].mxu1 }
 0x143   :  { %v2422_v63 = vpop.f32.mrb[7].mxu1 }
 0x150   :  { %v209_v13 = vpop.f32.mrb[0].mxu0 }
 0x151   :  { %v210_v14 = vadd.f32 %v209_v13, %v95_v12  ;;  %v2409_v15 = vpop.f32.mrb[1].mxu0  ;;  %v97_v13 = vld [vmem:[#allocation11 + $0x2] ss:$0 sm:$0xff] }
 0x152   :  { %v212_v16 = vpop.f32.mrb[2].mxu0 }
 0x153   :  { %v216_v17 = vmax.f32 %v210_v14, 0.0  ;;  %v213_v18 = vadd.f32 %v212_v16, %v95_v12  ;;  %v2410_v19 = vpop.f32.mrb[3].mxu0 }
 0x154   :  { %v2625_v19 = vld [vmem:[#allocation8 + $0x5c] ss:$36 sps:$4 sm:$0xff]  }
 0x155   :  { %218 = vadd.xlane.f32.xlu0 %v216_v17  ;;  %v217_v20 = vmax.f32 %v213_v18, 0.0 }
 0x159   :  { %220 = vadd.xlane.f32.xlu0 %v217_v20 }
 0x1e2   :  { %v219_v27 = vpop.xlane.xlu0 %218 }
 0x1e3   :  { %v223_v28 = vmul.f32 0.0078125, %v219_v27  ;;  %v2637_v27 = vld [vmem:[#allocation8 + $0x17c] ss:$36 sps:$4 sm:$0xff]  }
 0x1e5   :  { %v3030_v29 = vsub.f32 %v216_v17, %v223_v28  ;;  %v2620_v17 = vld [vmem:[#allocation8 + $0x10] ss:$36 sps:$4 sm:$0xff]   ;;  %v2635_v28 = vld [vmem:[#allocation8 + $0x178] ss:$36 sps:$4 sm:$0xff]  }
 0x1e6   :  { %v221_v30 = vpop.xlane.xlu0 %220 }
 0x1e7   :  { %v224_v31 = vmul.f32 0.0078125, %v221_v30  ;;  %v227_v32 = vmul.f32 %v3030_v29, %v3030_v29  ;;  %v2638_v30 = vld [vmem:[#allocation8 + $0x1c0] ss:$36 sps:$4 sm:$0xff]  }
 0x1e9   :  { %v3034_v33 = vsub.f32 %v217_v20, %v224_v31  ;;  %229 = vadd.xlane.f32.xlu1 %v227_v32  ;;  %v2623_v20 = vld [vmem:[#allocation8 + $0x58] ss:$36 sps:$4 sm:$0xff]   ;;  %v2643_v31 = vld [vmem:[#allocation8 + $0x20c] ss:$36 sps:$4 sm:$0xff]  }
 0x1ea   :  { %v2641_v32 = vld [vmem:[#allocation8 + $0x208] ss:$36 sps:$4 sm:$0xff]  }
 0x1eb   :  { %v228_v34 = vmul.f32 %v3034_v33, %v3034_v33 }
 0x1ed   :  { %231 = vadd.xlane.f32.xlu1 %v228_v34 }
 0x276   :  { %v230_v1 = vpop.xlane.xlu1 %229 }
 0x277   :  { %v233_v2 = vmul.f32 0.0078125, %v230_v1 }
 0x279   :  { %v235_v3 = vadd.f32 1e-05, %v233_v2 }
 0x27a   :  { %v232_v4 = vpop.xlane.xlu1 %231 }
 0x27b   :  { %2693 = vrsqrt.f32 %v235_v3  ;;  %v234_v5 = vmul.f32 0.0078125, %v232_v4 }
 0x27d   :  { %v236_v6 = vadd.f32 1e-05, %v234_v5 }
 0x27f   :  { %2695 = vrsqrt.f32 %v236_v6 }
 0x285   :  { %v2694_v7 = vpop.eup %2693 }
 0x286   :  { %v239_v8 = vmul.f32 %v2694_v7, %v3030_v29  ;;  %v2640_v29 = vld [vmem:[#allocation8 + $0x1c4] ss:$36 sps:$4 sm:$0xff]  }
 0x288   :  { %v241_v12 = vmul.f32 %v239_v8, %v96_v9 }
 0x289   :  { %v2696_v10 = vpop.eup %2695 }
 0x28a   :  { %v240_v11 = vmul.f32 %v2696_v10, %v3034_v33  ;;  %v3052_v15 = vadd.f32 %v241_v12, %v97_v13  ;;  %v2644_v33 = vld [vmem:[#allocation6] sm:$0xff]  }
 0x28c   :  { %v242_v14 = vmul.f32 %v240_v11, %v96_v9 }
 0x28e   :  { %v3054_v16 = vadd.f32 %v242_v14, %v97_v13 }
 0x290   :  { %v335_v18 = vpack.c.bf16 %v3054_v16, %v3052_v15 }
 0x292   :  { %529 = vmatmul.mubr.bf16.vlgmr.msra.gmra.mrb[8].mxu1 %v335_v18  ;;  %2440 = vmatmul.mubr.bf16.vlgmr.msra.gmra.mrb[4].mxu0 %v335_v18 }
 0x293   :  { %686 = vmatpush1.bf16.msra.mxu1 %v2620_v17  ;;  %717 = vmatprep.mubr.bf16.mxu1 %v2891_v55 }
 0x294   :  { %687 = vmatprep.subr.bf16.mxu1 %v2625_v19  ;;  %2457 = vmatprep.mubr.msk.bf16.mxu0 %vm2889_vm0, %v2888_v0 }
 0x297   :  { %688 = vmatpush1.bf16.msra.mxu1 %v2623_v20 }
 0x298   :  { %689 = vmatprep.subr.bf16.mxu1 %v2628_v21 }
 0x29b   :  { %690 = vmatpush1.bf16.msra.mxu1 %v2626_v22  ;;  %v1191_v22 = vlaneseq }
 0x29c   :  { %691 = vmatprep.subr.bf16.mxu1 %v2631_v23  ;;  %v327_v23 = vsel %vm325_vm3, -1e+30, %v2888_v0 }
 0x29f   :  { %692 = vmatpush1.bf16.msra.mxu1 %v2629_v24  ;;  %v3130_v24 = vshrl.u32 %v1191_v22, 7 }
 0x2a0   :  { %693 = vmatprep.subr.bf16.mxu1 %v2634_v25  ;;  %v330_v25 = vsel %vm329_vm4, %v327_v23, 0.0 }
 0x2a3   :  { %694 = vmatpush1.bf16.msra.mxu1 %v2632_v26  ;;  %v3133_v26 = vsub.s32 0, %v3130_v24 }
 0x2a4   :  { %695 = vmatprep.subr.bf16.mxu1 %v2637_v27  ;;  %v333_v27 = vsel %vm332_vm5, %v330_v25, -1e+30 }
 0x2a7   :  { %696 = vmatpush1.bf16.msra.mxu1 %v2635_v28  ;;  %v328_v28 = vsel %vm326_vm6, -1e+30, %v2888_v0 }
 0x2a8   :  { %697 = vmatprep.subr.bf16.mxu1 %v2640_v29 }
 0x2ab   :  { %698 = vmatpush1.bf16.msra.mxu1 %v2638_v30  ;;  %v1194_v30 = vrot.slane %v333_v27, %v3133_v26 }
 0x2ac   :  { %699 = vmatprep.subr.bf16.mxu1 %v2643_v31 }
 0x2af   :  { %700 = vmatpush1.bf16.msra.mxu1 %v2641_v32 }
 0x2b0   :  { %2443 = vmatprep.subr.bf16.mxu1 %v2888_v0 }
 0x2b2   :  { %718 = vmatmul.mubr.bf16.vlgmr.msra.gmra.mrb[12].mxu1 %v2644_v33  ;;  %v331_v33 = vsel %vm329_vm4, %v328_v28, 0.0 }
 0x2b3   :  { %2445 = vmatprep.mubr.msk.bf16.mxu1 %vm2889_vm0, %v2888_v0 }
 0x365   :  { %v530_v34 = vpop.f32.mrb[8].mxu1  ;;  %v573_v35 = vpop.f32.mrb[4].mxu0 }
 0x366   :  { %v2296_v36 = vpack.c.bf16 %v530_v34, %v530_v34  ;;  %v532_v37 = vpop.f32.mrb[9].mxu1  ;;  %v2441_v38 = vpop.f32.mrb[5].mxu0  ;;  %v2300_v47 = vpack.c.bf16 %v573_v35, %v573_v35 }
 0x367   :  { %v534_v39 = vpop.f32.mrb[10].mxu1  ;;  %v576_v40 = vpop.f32.mrb[6].mxu0  ;;  %v2298_v44 = vpack.c.bf16 %v532_v37, %v532_v37  ;;  %v334_v37 = vsel %vm332_vm5, %v331_v33, -1e+30 }
 0x368   :  { %770 = vrot.lane.b32.xlu1 %v2296_v36, %s2892_s4  ;;  %v536_v41 = vpop.f32.mrb[11].mxu1  ;;  %v2442_v42 = vpop.f32.mrb[7].mxu0  ;;  %v2301_v54 = vpack.c.bf16 %v576_v40, %v576_v40  ;;  %v2297_v63 = vpack.c.bf16 %v534_v39, %v534_v39  ;;  %v1198_v38 = vrot.slane %v334_v37, %v3133_v26 }
 0x369   :  { %v2299_v50 = vpack.c.bf16 %v536_v41, %v536_v41 }
 0x385   :  { %v719_v43 = vpop.f32.mrb[12].mxu1 }
 0x386   :  { %v2302_v45 = vpack.c.bf16 %v719_v43, %v719_v43  ;;  %v721_v46 = vpop.f32.mrb[13].mxu1 }
 0x387   :  { %v2304_v48 = vpack.c.bf16 %v721_v46, %v721_v46  ;;  %v723_v49 = vpop.f32.mrb[14].mxu1 }
 0x388   :  { %v2303_v51 = vpack.c.bf16 %v723_v49, %v723_v49  ;;  %v725_v52 = vpop.f32.mrb[15].mxu1  ;;  %v756_v53 = vsel %vm753_vm1, %v2298_v44, %v2302_v45 }
 0x389   :  { %v2305_v57 = vpack.c.bf16 %v725_v52, %v725_v52  ;;  %784 = vrot.lane.b32.xlu0 %v756_v53, %s2892_s4  ;;  %v820_v58 = vsel %vm816_vm2, %v756_v53, 0  ;;  %v3069_v59 = vsel %vm753_vm1, %v2300_v47, %v2304_v48 }
 0x38a   :  { %2444 = vmatpush3.bf16.xpose.msra.mxu1 %v820_v58  ;;  %v759_v61 = vsel %vm753_vm1, %v2299_v50, %v2303_v51 }
 0x38b   :  { %786 = vrot.lane.b32.xlu1 %v759_v61, %s2892_s4  ;;  %2449 = vmatprep.subr.bf16.mxu1 %v2888_v0  ;;  %v3075_v62 = vsel %vm753_vm1, %v2301_v54, %v2305_v57  ;;  %v865_v1 = vsel %vm816_vm2, %v759_v61, 0 }
 0x38d   :  { %788 = vrot.lane.b32.xlu0 %v756_v53, %s2879_s30 }
 0x38f   :  { %772 = vrot.lane.b32.xlu1 %v2297_v63, %s2892_s4 }
 0x391   :  { %774 = vrot.lane.b32.xlu0 %v2296_v36, %s2879_s30  ;;  %2446 = vmatmul.mubr.msk.bf16.vlgmr.msra.gmra.mrb[16].mxu1 %vm816_vm2, %v2296_v36 }
 0x392   :  { %2450 = vmatpush3.bf16.xpose.msra.mxu1 %v865_v1  ;;  %2451 = vmatprep.mubr.msk.bf16.mxu1 %vm2889_vm0, %v2888_v0 }
 0x393   :  { %790 = vrot.lane.b32.xlu1 %v759_v61, %s2879_s30  ;;  %2461 = vmatprep.subr.bf16.mxu1 %v2888_v0 }
 0x395   :  { %792 = vrot.lane.b32.xlu0 %v756_v53, %s2893_s21 }
 0x397   :  { %776 = vrot.lane.b32.xlu1 %v2297_v63, %s2879_s30 }
 0x399   :  { %778 = vrot.lane.b32.xlu0 %v2296_v36, %s2893_s21  ;;  %2452 = vmatmul.mubr.msk.bf16.vlgmr.msra.gmra.mrb[20].mxu1 %vm816_vm2, %v2297_v63 }
 0x39a   :  { %2463 = vmatprep.mubr.msk.bf16.mxu1 %vm2889_vm0, %v2888_v0 }
 0x39b   :  { %794 = vrot.lane.b32.xlu1 %v759_v61, %s2893_s21 }
 0x39f   :  { %780 = vrot.lane.b32.xlu1 %v2297_v63, %s2893_s21 }
 0x3da   :  { %v771_v2 = vpop.permute.xlu1 %770 }
 0x3fb   :  { %v785_v3 = vpop.permute.xlu0 %784 }
 0x3fc   :  { %v911_v4 = vsel %vm816_vm2, %v785_v3, 0 }
 0x3fd   :  { %2456 = vmatpush3.bf16.xpose.msra.mxu0 %v911_v4  ;;  %v787_v5 = vpop.permute.xlu1 %786 }
 0x3fe   :  { %v957_v6 = vsel %vm816_vm2, %v787_v5, 0  ;;  %2467 = vmatprep.subr.bf16.mxu0 %v2888_v0 }
 0x3ff   :  { %v789_v7 = vpop.permute.xlu0 %788  ;;  %2462 = vmatpush3.bf16.xpose.msra.mxu1 %v957_v6 }
 0x400   :  { %2473 = vmatprep.subr.bf16.mxu1 %v2888_v0  ;;  %v1003_v10 = vsel %vm816_vm2, %v789_v7, 0 }
 0x401   :  { %v773_v8 = vpop.permute.xlu1 %772 }
 0x403   :  { %v775_v9 = vpop.permute.xlu0 %774 }
 0x404   :  { %2458 = vmatmul.mubr.msk.bf16.vlgmr.msra.gmra.mrb[8].mxu0 %vm816_vm2, %v771_v2 }
 0x405   :  { %2468 = vmatpush3.bf16.xpose.msra.mxu0 %v1003_v10  ;;  %v791_v11 = vpop.permute.xlu1 %790  ;;  %2469 = vmatprep.mubr.msk.bf16.mxu0 %vm2889_vm0, %v2888_v0 }
 0x406   :  { %v1049_v12 = vsel %vm816_vm2, %v791_v11, 0  ;;  %2464 = vmatmul.mubr.msk.bf16.vlgmr.msra.gmra.mrb[24].mxu1 %vm816_vm2, %v773_v8  ;;  %2479 = vmatprep.subr.bf16.mxu0 %v2888_v0 }
 0x407   :  { %2474 = vmatpush3.bf16.xpose.msra.mxu1 %v1049_v12  ;;  %2475 = vmatprep.mubr.msk.bf16.mxu1 %vm2889_vm0, %v2888_v0  ;;  %v793_v13 = vpop.permute.xlu0 %792 }
 0x408   :  { %2485 = vmatprep.subr.bf16.mxu1 %v2888_v0  ;;  %v1095_v17 = vsel %vm816_vm2, %v793_v13, 0 }
 0x409   :  { %v777_v14 = vpop.permute.xlu1 %776 }
 0x40b   :  { %v779_v20 = vpop.permute.xlu0 %778 }
 0x40c   :  { %2470 = vmatmul.mubr.msk.bf16.vlgmr.msra.gmra.mrb[12].mxu0 %vm816_vm2, %v775_v9 }
 0x40d   :  { %2480 = vmatpush3.bf16.xpose.msra.mxu0 %v1095_v17  ;;  %v795_v18 = vpop.permute.xlu1 %794  ;;  %2481 = vmatprep.mubr.msk.bf16.mxu0 %vm2889_vm0, %v2888_v0 }
 0x40e   :  { %v1141_v19 = vsel %vm816_vm2, %v795_v18, 0  ;;  %2476 = vmatmul.mubr.msk.bf16.vlgmr.msra.gmra.mrb[28].mxu1 %vm816_vm2, %v777_v14  ;;  %2491 = vmatprep.subr.bf16.mxu0 %v2888_v0 }
 0x40f   :  { %2486 = vmatpush3.bf16.xpose.msra.mxu1 %v1141_v19  ;;  %2487 = vmatprep.mubr.msk.bf16.mxu1 %vm2889_vm0, %v2888_v0 }
 0x410   :  { %2497 = vmatprep.subr.bf16.mxu1 %v2888_v0 }
 0x411   :  { %v781_v21 = vpop.permute.xlu1 %780 }
 0x414   :  { %2482 = vmatmul.mubr.msk.bf16.vlgmr.msra.gmra.mrb[16].mxu0 %vm816_vm2, %v779_v20 }
 0x415   :  { %2492 = vmatpush3.bf16.msra.mxu0 %v3069_v59  ;;  %2493 = vmatprep.mubr.msk.bf16.mxu0 %vm2889_vm0, %v2888_v0 }
 0x416   :  { %2488 = vmatmul.mubr.msk.bf16.vlgmr.msra.gmra.mrb[32].mxu1 %vm816_vm2, %v781_v21  ;;  %2503 = vmatprep.subr.bf16.mxu0 %v2888_v0 }
 0x417   :  { %2498 = vmatpush3.bf16.msra.mxu1 %v3075_v62  ;;  %2499 = vmatprep.mubr.msk.bf16.mxu1 %vm2889_vm0, %v2888_v0 }
 0x418   :  { %2509 = vmatprep.subr.bf16.mxu1 %v2888_v0 }
 0x464   :  { %v856_v29 = vpop.f32.mrb[16].mxu1 }
 0x465   :  { %v1183_v56 = vmul.f32 0.17677669, %v856_v29  ;;  %v2447_v31 = vpop.f32.mrb[17].mxu1 }
 0x466   :  { %v859_v32 = vpop.f32.mrb[18].mxu1 }
 0x467   :  { %v2448_v34 = vpop.f32.mrb[19].mxu1  ;;  %v3138_v35 = vadd.f32 %v1194_v30, %v1183_v56 }
 0x469   :  { %v1208_v36 = vsel %vm1207_vm7, %v3138_v35, -inf }
 0x46a   :  { %1209 = vmax.xlane.f32.xlu0 %v1208_v36 }
 0x46c   :  { %v901_v60 = vpop.f32.mrb[20].mxu1 }
 0x46d   :  { %v1184_v39 = vmul.f32 0.17677669, %v901_v60  ;;  %v2453_v40 = vpop.f32.mrb[21].mxu1 }
 0x46e   :  { %v904_v41 = vpop.f32.mrb[22].mxu1 }
 0x46f   :  { %v2454_v42 = vpop.f32.mrb[23].mxu1  ;;  %v1200_v43 = vadd.f32 %v1198_v38, %v1184_v39 }
 0x471   :  { %v1211_v44 = vsel %vm1207_vm7, %v1200_v43, -inf }
 0x472   :  { %1212 = vmax.xlane.f32.xlu1 %v1211_v44 }
 0x4d7   :  { %v947_v45 = vpop.f32.mrb[8].mxu0 }
 0x4d8   :  { %v1185_v46 = vmul.f32 0.17677669, %v947_v45  ;;  %v2459_v47 = vpop.f32.mrb[9].mxu0 }
 0x4d9   :  { %v950_v48 = vpop.f32.mrb[10].mxu0  ;;  %v993_v49 = vpop.f32.mrb[24].mxu1 }
 0x4da   :  { %v1186_v50 = vmul.f32 0.17677669, %v993_v49  ;;  %v2460_v51 = vpop.f32.mrb[11].mxu0  ;;  %v2465_v52 = vpop.f32.mrb[25].mxu1  ;;  %v1201_v53 = vadd.f32 %v1194_v30, %v1185_v46 }
 0x4db   :  { %v996_v54 = vpop.f32.mrb[26].mxu1 }
 0x4dc   :  { %v2466_v57 = vpop.f32.mrb[27].mxu1  ;;  %v1214_v58 = vsel %vm1207_vm7, %v1201_v53, -inf  ;;  %v1202_v61 = vadd.f32 %v1198_v38, %v1186_v50 }
 0x4dd   :  { %1215 = vmax.xlane.f32.xlu0 %v1214_v58 }
 0x4de   :  { %v1217_v3 = vsel %vm1207_vm7, %v1202_v61, -inf }
 0x4df   :  { %v1039_v63 = vpop.f32.mrb[12].mxu0 }
 0x4e0   :  { %v1187_v1 = vmul.f32 0.17677669, %v1039_v63  ;;  %v2471_v2 = vpop.f32.mrb[13].mxu0 }
 0x4e1   :  { %v1085_v4 = vpop.f32.mrb[28].mxu1  ;;  %1218 = vmax.xlane.f32.xlu0 %v1217_v3  ;;  %v1042_v5 = vpop.f32.mrb[14].mxu0 }
 0x4e2   :  { %v1188_v6 = vmul.f32 0.17677669, %v1085_v4  ;;  %v2472_v7 = vpop.f32.mrb[15].mxu0  ;;  %v2477_v8 = vpop.f32.mrb[29].mxu1  ;;  %v3146_v9 = vadd.f32 %v1194_v30, %v1187_v1 }
 0x4e3   :  { %v1088_v10 = vpop.f32.mrb[30].mxu1 }
 0x4e4   :  { %v2478_v11 = vpop.f32.mrb[31].mxu1  ;;  %v1220_v12 = vsel %vm1207_vm7, %v3146_v9, -inf  ;;  %v1204_v13 = vadd.f32 %v1198_v38, %v1188_v6 }
 0x4e5   :  { %1221 = vmax.xlane.f32.xlu0 %v1220_v12 }
 0x4e6   :  { %v1223_v14 = vsel %vm1207_vm7, %v1204_v13, -inf }
 0x4e7   :  { %1224 = vmax.xlane.f32.xlu1 %v1223_v14  ;;  %v1131_v17 = vpop.f32.mrb[16].mxu0 }
 0x4e8   :  { %v1189_v18 = vmul.f32 0.17677669, %v1131_v17  ;;  %v2483_v19 = vpop.f32.mrb[17].mxu0 }
 0x4e9   :  { %v1134_v20 = vpop.f32.mrb[18].mxu0  ;;  %v1177_v21 = vpop.f32.mrb[32].mxu1 }
 0x4ea   :  { %v1190_v22 = vmul.f32 0.17677669, %v1177_v21  ;;  %v2484_v23 = vpop.f32.mrb[19].mxu0  ;;  %v2489_v25 = vpop.f32.mrb[33].mxu1  ;;  %v3151_v27 = vadd.f32 %v1194_v30, %v1189_v18 }
 0x4eb   :  { %v1180_v28 = vpop.f32.mrb[34].mxu1 }
 0x4ec   :  { %v2490_v29 = vpop.f32.mrb[35].mxu1  ;;  %v1226_v56 = vsel %vm1207_vm7, %v3151_v27, -inf  ;;  %v1206_v31 = vadd.f32 %v1198_v38, %v1190_v22 }
 0x4ed   :  { %1227 = vmax.xlane.f32.xlu0 %v1226_v56 }
 0x4ee   :  { %v1229_v32 = vsel %vm1207_vm7, %v1206_v31, -inf }
 0x4ef   :  { %1230 = vmax.xlane.f32.xlu1 %v1229_v32 }
 0x4f7   :  { %v1210_v33 = vpop.xlane.xlu0 %1209 }
 0x4f8   :  { %v1232_v34 = vsub.f32 %v3138_v35, %v1210_v33 }
 0x4fa   :  { %v1240_v36 = vmul.f32 1.442695, %v1232_v34 }
 0x4fc   :  { %2697 = vpow2.f32 %v1240_v36 }
 0x4ff   :  { %v1213_v37 = vpop.xlane.xlu1 %1212 }
 0x500   :  { %v1233_v60 = vsub.f32 %v1200_v43, %v1213_v37 }
 0x502   :  { %v1242_v39 = vmul.f32 1.442695, %v1233_v60 }
 0x504   :  { %2699 = vpow2.f32 %v1242_v39 }
 0x506   :  { %v2698_v30 = vpop.eup %2697 }
 0x507   :  { %v1256_v40 = vsel %vm1207_vm7, %v2698_v30, 0.0 }
 0x508   :  { %1257 = vadd.xlane.f32.xlu0 %v1256_v40 }
 0x50e   :  { %v2700_v41 = vpop.eup %2699 }
 0x50f   :  { %v1259_v38 = vsel %vm1207_vm7, %v2700_v41, 0.0 }
 0x510   :  { %1260 = vadd.xlane.f32.xlu1 %v1259_v38 }
 0x521   :  { %800 = vrot.lane.b32.xlu1 %v3075_v62, %s2892_s4 }
 0x525   :  { %804 = vrot.lane.b32.xlu1 %v3069_v59, %s2879_s30 }
 0x529   :  { %806 = vrot.lane.b32.xlu1 %v3075_v62, %s2879_s30 }
 0x56a   :  { %v1216_v35 = vpop.xlane.xlu0 %1215 }
 0x56b   :  { %v1234_v42 = vsub.f32 %v1201_v53, %v1216_v35 }
 0x56d   :  { %v1244_v43 = vmul.f32 1.442695, %v1234_v42 }
 0x56e   :  { %v1219_v44 = vpop.xlane.xlu0 %1218 }
 0x56f   :  { %2701 = vpow2.f32 %v1244_v43  ;;  %v1235_v45 = vsub.f32 %v1202_v61, %v1219_v44 }
 0x571   :  { %v1246_v46 = vmul.f32 1.442695, %v1235_v45 }
 0x572   :  { %v1222_v3 = vpop.xlane.xlu0 %1221 }
 0x573   :  { %2703 = vpow2.f32 %v1246_v46  ;;  %v1236_v6 = vsub.f32 %v3146_v9, %v1222_v3 }
 0x574   :  { %v1225_v47 = vpop.xlane.xlu1 %1224 }
 0x575   :  { %v1237_v48 = vsub.f32 %v1204_v13, %v1225_v47  ;;  %v1248_v8 = vmul.f32 1.442695, %v1236_v6 }
 0x577   :  { %v1250_v49 = vmul.f32 1.442695, %v1237_v48 }
 0x579   :  { %v3165_v50 = vpop.eup %2701  ;;  %2705 = vpow2.f32 %v1250_v49 }
 0x57a   :  { %v1262_v51 = vsel %vm1207_vm7, %v3165_v50, 0.0  ;;  %v1228_v4 = vpop.xlane.xlu0 %1227 }
 0x57b   :  { %1263 = vadd.xlane.f32.xlu0 %v1262_v51  ;;  %v1238_v10 = vsub.f32 %v3151_v27, %v1228_v4  ;;  %v2647_v4 = vld [vmem:[#allocation8 + $0xa8] ss:$36 sps:$4 sm:$0xff]  }
 0x57c   :  { %v1231_v52 = vpop.xlane.xlu1 %1230 }
 0x57d   :  { %v2704_v54 = vpop.eup %2703  ;;  %v1239_v57 = vsub.f32 %v1206_v31, %v1231_v52  ;;  %v1252_v13 = vmul.f32 1.442695, %v1238_v10  ;;  %v2648_v10 = vld [vmem:[#allocation8 + $0xf0] ss:$36 sps:$4 sm:$0xff]  }
 0x57e   :  { %v1265_v53 = vsel %vm1207_vm7, %v2704_v54, 0.0 }
 0x57f   :  { %v1254_v58 = vmul.f32 1.442695, %v1239_v57  ;;  %1266 = vadd.xlane.f32.xlu1 %v1265_v53 }
 0x581   :  { %2707 = vpow2.f32 %v1254_v58 }
 0x583   :  { %v3170_v61 = vpop.eup %2705 }
 0x584   :  { %v1271_v63 = vsel %vm1207_vm7, %v3170_v61, 0.0 }
 0x585   :  { %1272 = vadd.xlane.f32.xlu1 %v1271_v63 }
 0x58b   :  { %v3174_v1 = vpop.eup %2707 }
 0x58c   :  { %v1277_v2 = vsel %vm1207_vm7, %v3174_v1, 0.0 }
 0x58d   :  { %1278 = vadd.xlane.f32.xlu1 %v1277_v2  ;;  %v2646_v2 = vld [vmem:[#allocation8 + $0x60] ss:$36 sps:$4 sm:$0xff]  }
 0x591   :  { %798 = vrot.lane.b32.xlu0 %v3069_v59, %s2892_s4 }
 0x595   :  { %v1258_v5 = vpop.xlane.xlu0 %1257 }
 0x596   :  { %2709 = vrcp.f32 %v1258_v5 }
 0x59d   :  { %v1261_v7 = vpop.xlane.xlu1 %1260 }
 0x59e   :  { %2711 = vrcp.f32 %v1261_v7  ;;  %812 = vrot.lane.b32.xlu1 %v3075_v62, %s2893_s21 }
 0x59f   :  { %2713 = vpow2.f32 %v1248_v8 }
 0x5a0   :  { %v2710_v11 = vpop.eup %2709  ;;  %2715 = vpow2.f32 %v1252_v13 }
 0x5a1   :  { %v1288_v12 = vmul.f32 %v2710_v11, %v2698_v30  ;;  %v801_v20 = vpop.permute.xlu1 %800 }
 0x5a3   :  { %v1296_v14 = vpack.c.bf16 %v1288_v12, %v1288_v12 }
 0x5a5   :  { %2494 = vmatmul.mubr.msk.bf16.vlgmr.msra.gmra.mrb[20].mxu0 %vm1207_vm7, %v1296_v14  ;;  %v805_v23 = vpop.permute.xlu1 %804 }
 0x5a6   :  { %2505 = vmatprep.mubr.msk.bf16.mxu0 %vm2889_vm0, %v2888_v0 }
 0x5a8   :  { %v2712_v9 = vpop.eup %2711 }
 0x5a9   :  { %v1289_v17 = vmul.f32 %v2712_v9, %v2700_v41  ;;  %v2714_v19 = vpop.eup %2713  ;;  %v807_v25 = vpop.permute.xlu1 %806 }
 0x5aa   :  { %v1268_v62 = vsel %vm1207_vm7, %v2714_v19, 0.0  ;;  %v2716_v21 = vpop.eup %2715 }
 0x5ab   :  { %v1297_v18 = vpack.c.bf16 %v1289_v17, %v1289_v17  ;;  %v1274_v22 = vsel %vm1207_vm7, %v2716_v21, 0.0 }
 0x5ad   :  { %2500 = vmatmul.mubr.msk.bf16.vlgmr.msra.gmra.mrb[36].mxu1 %vm1207_vm7, %v1297_v18 }
 0x5ae   :  { %2510 = vmatpush3.bf16.msra.mxu1 %v801_v20  ;;  %2511 = vmatprep.mubr.msk.bf16.mxu1 %vm2889_vm0, %v2888_v0 }
 0x5af   :  { %2521 = vmatprep.subr.bf16.mxu1 %v2888_v0 }
 0x5b0   :  { %1269 = vadd.xlane.f32.xlu0 %v1268_v62 }
 0x5b4   :  { %1275 = vadd.xlane.f32.xlu0 %v1274_v22 }
 0x5ca   :  { %810 = vrot.lane.b32.xlu0 %v3069_v59, %s2893_s21 }
 0x608   :  { %v1264_v27 = vpop.xlane.xlu0 %1263 }
 0x609   :  { %2717 = vrcp.f32 %v1264_v27  ;;  %v2651_v27 = vld [vmem:[#allocation8 + $0x1c8] ss:$36 sps:$4 sm:$0xff]  }
 0x60c   :  { %v1267_v28 = vpop.xlane.xlu1 %1266  ;;  %v799_v29 = vpop.permute.xlu0 %798 }
 0x60d   :  { %2719 = vrcp.f32 %v1267_v28  ;;  %2504 = vmatpush3.bf16.msra.mxu0 %v799_v29  ;;  %v2652_v29 = vld [vmem:[#allocation8 + $0x210] ss:$36 sps:$4 sm:$0xff]  }
 0x60e   :  { %2515 = vmatprep.subr.bf16.mxu0 %v2888_v0 }
 0x612   :  { %v1273_v56 = vpop.xlane.xlu1 %1272 }
 0x613   :  { %v2718_v31 = vpop.eup %2717  ;;  %2721 = vrcp.f32 %v1273_v56 }
 0x614   :  { %v1290_v32 = vmul.f32 %v2718_v31, %v3165_v50 }
 0x616   :  { %v1298_v33 = vpack.c.bf16 %v1290_v32, %v1290_v32 }
 0x617   :  { %v2720_v34 = vpop.eup %2719 }
 0x618   :  { %v1291_v36 = vmul.f32 %v2720_v34, %v2704_v54  ;;  %2506 = vmatmul.mubr.msk.bf16.vlgmr.msra.gmra.mrb[24].mxu0 %vm1207_vm7, %v1298_v33 }
 0x619   :  { %2516 = vmatpush3.bf16.msra.mxu0 %v805_v23  ;;  %2517 = vmatprep.mubr.msk.bf16.mxu0 %vm2889_vm0, %v2888_v0  ;;  %v2649_v23 = vld [vmem:[#allocation8 + $0x138] ss:$36 sps:$4 sm:$0xff]  }
 0x61a   :  { %v1279_v59 = vpop.xlane.xlu1 %1278  ;;  %v1299_v37 = vpack.c.bf16 %v1291_v36, %v1291_v36  ;;  %2527 = vmatprep.subr.bf16.mxu0 %v2888_v0 }
 0x61b   :  { %2723 = vrcp.f32 %v1279_v59 }
 0x61c   :  { %2512 = vmatmul.mubr.msk.bf16.vlgmr.msra.gmra.mrb[40].mxu1 %vm1207_vm7, %v1299_v37 }
 0x61d   :  { %v2722_v60 = vpop.eup %2721  ;;  %2522 = vmatpush3.bf16.msra.mxu1 %v807_v25  ;;  %2523 = vmatprep.mubr.msk.bf16.mxu1 %vm2889_vm0, %v2888_v0  ;;  %v2650_v25 = vld [vmem:[#allocation8 + $0x180] ss:$36 sps:$4 sm:$0xff]  }
 0x61e   :  { %v1293_v39 = vmul.f32 %v2722_v60, %v3170_v61  ;;  %2533 = vmatprep.subr.bf16.mxu1 %v2888_v0  ;;  %v813_v40 = vpop.permute.xlu1 %812 }
 0x620   :  { %v1301_v30 = vpack.c.bf16 %v1293_v39, %v1293_v39 }
 0x624   :  { %2524 = vmatmul.mubr.msk.bf16.vlgmr.msra.gmra.mrb[44].mxu1 %vm1207_vm7, %v1301_v30 }
 0x625   :  { %v2724_v41 = vpop.eup %2723  ;;  %2534 = vmatpush3.bf16.msra.mxu1 %v813_v40  ;;  %2535 = vmatprep.mubr.msk.bf16.mxu1 %vm2889_vm0, %v2888_v0 }
 0x626   :  { %v1295_v38 = vmul.f32 %v2724_v41, %v3174_v1  ;;  %v2645_v1 = vld [vmem:[#allocation8 + $0x18] ss:$36 sps:$4 sm:$0xff]  }
 0x628   :  { %v1303_v35 = vpack.c.bf16 %v1295_v38, %v1295_v38 }
 0x62c   :  { %2536 = vmatmul.mubr.msk.bf16.vlgmr.msra.gmra.mrb[48].mxu1 %vm1207_vm7, %v1303_v35 }
 0x62d   :  { %1945 = vmatprep.mubr.bf16.mxu1 %v2891_v55 }
 0x63d   :  { %v1270_v42 = vpop.xlane.xlu0 %1269 }
 0x63e   :  { %2725 = vrcp.f32 %v1270_v42 }
 0x641   :  { %v1276_v43 = vpop.xlane.xlu0 %1275 }
 0x642   :  { %2727 = vrcp.f32 %v1276_v43 }
 0x645   :  { %v811_v48 = vpop.permute.xlu0 %810 }
 0x648   :  { %v2726_v44 = vpop.eup %2725 }
 0x649   :  { %v1292_v45 = vmul.f32 %v2726_v44, %v2714_v19 }
 0x64b   :  { %v1300_v46 = vpack.c.bf16 %v1292_v45, %v1292_v45  ;;  %v2653_v45 = vld [vmem:[#allocation8 + $0x1c] ss:$36 sps:$4 sm:$0xff]  }
 0x64c   :  { %v2728_v47 = vpop.eup %2727 }
 0x64d   :  { %2518 = vmatmul.mubr.msk.bf16.vlgmr.msra.gmra.mrb[28].mxu0 %vm1207_vm7, %v1300_v46  ;;  %v1294_v49 = vmul.f32 %v2728_v47, %v2716_v21  ;;  %v2655_v46 = vld [vmem:[#allocation8 + $0x20] ss:$36 sps:$4 sm:$0xff]   ;;  %v2658_v47 = vld [vmem:[#allocation8 + $0x68] ss:$36 sps:$4 sm:$0xff]  }
 0x64e   :  { %2528 = vmatpush3.bf16.msra.mxu0 %v811_v48  ;;  %2529 = vmatprep.mubr.msk.bf16.mxu0 %vm2889_vm0, %v2888_v0  ;;  %v2656_v48 = vld [vmem:[#allocation8 + $0x64] ss:$36 sps:$4 sm:$0xff]  }
 0x64f   :  { %2539 = vmatprep.subr.bf16.mxu0 %v2888_v0  ;;  %v1302_v50 = vpack.c.bf16 %v1294_v49, %v1294_v49  ;;  %1913 = vmatprep.subr.bf16.mxu1 %v2655_v46 }
 0x650   :  { %1914 = vmatpush1.bf16.msra.mxu1 %v2653_v45 }
 0x651   :  { %1915 = vmatprep.subr.bf16.mxu1 %v2658_v47 }
 0x654   :  { %1916 = vmatpush1.bf16.msra.mxu1 %v2656_v48 }
 0x655   :  { %2530 = vmatmul.mubr.msk.bf16.vlgmr.msra.gmra.mrb[32].mxu0 %vm1207_vm7, %v1302_v50 }
 0x656   :  { %2555 = vmatprep.mubr.msk.bf16.mxu0 %vm2889_vm0, %v2888_v0  ;;  %2540 = vmatpush3.bf16.msra.mxu0 %v2645_v1  ;;  %v2665_v1 = vld [vmem:[#allocation8 + $0x13c] ss:$36 sps:$4 sm:$0xff]  }
 0x657   :  { %2541 = vmatprep.subr.bf16.mxu0 %v2888_v0 }
 0x65a   :  { %2542 = vmatpush3.bf16.msra.mxu0 %v2646_v2  ;;  %v2670_v2 = vld [vmem:[#allocation8 + $0x188] ss:$36 sps:$4 sm:$0xff]  }
 0x65b   :  { %2543 = vmatprep.subr.bf16.mxu0 %v2888_v0 }
 0x65e   :  { %2544 = vmatpush3.bf16.msra.mxu0 %v2647_v4  ;;  %v2673_v4 = vld [vmem:[#allocation8 + $0x1d0] ss:$36 sps:$4 sm:$0xff]  }
 0x65f   :  { %2545 = vmatprep.subr.bf16.mxu0 %v2888_v0 }
 0x662   :  { %2546 = vmatpush3.bf16.msra.mxu0 %v2648_v10  ;;  %v2678_v10 = vld [vmem:[#allocation9] sm:$0xff]  }
 0x663   :  { %2547 = vmatprep.subr.bf16.mxu0 %v2888_v0 }
 0x666   :  { %2548 = vmatpush3.bf16.msra.mxu0 %v2649_v23 }
 0x667   :  { %2549 = vmatprep.subr.bf16.mxu0 %v2888_v0 }
 0x66a   :  { %2550 = vmatpush3.bf16.msra.mxu0 %v2650_v25 }
 0x66b   :  { %2551 = vmatprep.subr.bf16.mxu0 %v2888_v0 }
 0x66e   :  { %2552 = vmatpush3.bf16.msra.mxu0 %v2651_v27 }
 0x66f   :  { %2553 = vmatprep.subr.bf16.mxu0 %v2888_v0 }
 0x672   :  { %2554 = vmatpush3.bf16.msra.mxu0 %v2652_v29 }
 0x678   :  { %v1341_v55 = vpop.f32.mrb[20].mxu0 }
 0x679   :  { %v2495_v51 = vpop.f32.mrb[21].mxu0 }
 0x67a   :  { %v1344_v52 = vpop.f32.mrb[22].mxu0 }
 0x67b   :  { %v2496_v54 = vpop.f32.mrb[23].mxu0 }
 0x680   :  { %v1384_v57 = vpop.f32.mrb[36].mxu1 }
 0x681   :  { %v1648_v53 = vpack.c.bf16 %v1384_v57, %v1341_v55  ;;  %v2501_v58 = vpop.f32.mrb[37].mxu1  ;;  %v2661_v57 = vld [vmem:[#allocation8 + $0xb0] ss:$36 sps:$4 sm:$0xff]  }
 0x682   :  { %v1387_v61 = vpop.f32.mrb[38].mxu1  ;;  %1917 = vmatprep.subr.bf16.mxu1 %v2661_v57  ;;  %v2664_v58 = vld [vmem:[#allocation8 + $0xf8] ss:$36 sps:$4 sm:$0xff]  }
 0x683   :  { %1649 = vst.msk [vmem:[#allocation2] sm:$0xff] %vm816_vm2, %v1648_v53  ;;  %v2502_v63 = vpop.f32.mrb[39].mxu1  ;;  %v2659_v53 = vld [vmem:[#allocation8 + $0xac] ss:$36 sps:$4 sm:$0xff]   ;;  %v2662_v61 = vld [vmem:[#allocation8 + $0xf4] ss:$36 sps:$4 sm:$0xff]  }
 0x684   :  { %1918 = vmatpush1.bf16.msra.mxu1 %v2659_v53  ;;  %v2667_v63 = vld [vmem:[#allocation8 + $0x140] ss:$36 sps:$4 sm:$0xff]  }
 0x685   :  { %1919 = vmatprep.subr.bf16.mxu1 %v2664_v58  ;;  %v102_v53 = vld [vmem:[#allocation11 + $0x7] ss:$0 sm:$0xff] }
 0x688   :  { %1920 = vmatpush1.bf16.msra.mxu1 %v2662_v61 }
 0x689   :  { %1921 = vmatprep.subr.bf16.mxu1 %v2667_v63 }
 0x68c   :  { %1922 = vmatpush1.bf16.msra.mxu1 %v2665_v1 }
 0x68d   :  { %1923 = vmatprep.subr.bf16.mxu1 %v2670_v2 }
 0x6eb   :  { %v1427_v3 = vpop.f32.mrb[24].mxu0 }
 0x6ec   :  { %v2507_v5 = vpop.f32.mrb[25].mxu0 }
 0x6ed   :  { %v1430_v6 = vpop.f32.mrb[26].mxu0  ;;  %v2671_v5 = vld [vmem:[#allocation8 + $0x1cc] ss:$36 sps:$4 sm:$0xff]  }
 0x6ee   :  { %v2508_v7 = vpop.f32.mrb[27].mxu0  ;;  %v2676_v6 = vld [vmem:[#allocation8 + $0x218] ss:$36 sps:$4 sm:$0xff]  }
 0x6ef   :  { %v1470_v8 = vpop.f32.mrb[40].mxu1  ;;  %v2674_v7 = vld [vmem:[#allocation8 + $0x214] ss:$36 sps:$4 sm:$0xff]  }
 0x6f0   :  { %v1650_v11 = vpack.c.bf16 %v1470_v8, %v1427_v3  ;;  %v2513_v12 = vpop.f32.mrb[41].mxu1  ;;  %v2668_v3 = vld [vmem:[#allocation8 + $0x184] ss:$36 sps:$4 sm:$0xff]  }
 0x6f1   :  { %v1473_v13 = vpop.f32.mrb[42].mxu1  ;;  %1924 = vmatpush1.bf16.msra.mxu1 %v2668_v3  ;;  %v2677_v8 = vld [vmem:[#allocation9 + $0x40] sm:$0xff]   ;;  %v2680_v12 = vld [vmem:[#allocation9 + $0x8] sm:$0xff]  }
 0x6f2   :  { %v2514_v14 = vpop.f32.mrb[43].mxu1  ;;  %1652 = vrot.lane.b32.xlu0 %v1650_v11, %s2893_s21  ;;  %1925 = vmatprep.subr.bf16.mxu1 %v2673_v4  ;;  %v2679_v11 = vld [vmem:[#allocation9 + $0x48] sm:$0xff]   ;;  %v2681_v13 = vld [vmem:[#allocation9 + $0x50] sm:$0xff]  }
 0x6f3   :  { %2369 = vmatprep.subr.bf16.mxu0 %v2677_v8  ;;  %v2682_v14 = vld [vmem:[#allocation9 + $0x10] sm:$0xff]  }
 0x6f5   :  { %1926 = vmatpush1.bf16.msra.mxu1 %v2671_v5 }
 0x6f6   :  { %1927 = vmatprep.subr.bf16.mxu1 %v2676_v6 }
 0x6f7   :  { %v1556_v9 = vpop.f32.mrb[44].mxu1 }
 0x6f8   :  { %v2525_v17 = vpop.f32.mrb[45].mxu1 }
 0x6f9   :  { %v1559_v18 = vpop.f32.mrb[46].mxu1  ;;  %1928 = vmatpush1.bf16.msra.mxu1 %v2674_v7  ;;  %v2684_v17 = vld [vmem:[#allocation9 + $0x18] sm:$0xff]  }
 0x6fa   :  { %v2526_v19 = vpop.f32.mrb[47].mxu1  ;;  %v2685_v18 = vld [vmem:[#allocation9 + $0x60] sm:$0xff]  }
 0x6fb   :  { %v2686_v19 = vld [vmem:[#allocation9 + $0x20] sm:$0xff]  }
 0x6ff   :  { %v1642_v20 = vpop.f32.mrb[48].mxu1 }
 0x700   :  { %v2537_v62 = vpop.f32.mrb[49].mxu1 }
 0x701   :  { %v1645_v21 = vpop.f32.mrb[50].mxu1 }
 0x702   :  { %v2538_v22 = vpop.f32.mrb[51].mxu1 }
 0x720   :  { %v1513_v28 = vpop.f32.mrb[28].mxu0 }
 0x721   :  { %v1657_v56 = vpack.c.bf16 %v1556_v9, %v1513_v28  ;;  %v2519_v31 = vpop.f32.mrb[29].mxu0  ;;  %v2683_v9 = vld [vmem:[#allocation9 + $0x58] sm:$0xff]  }
 0x722   :  { %v1516_v32 = vpop.f32.mrb[30].mxu0 }
 0x723   :  { %1659 = vrot.lane.b32.xlu1 %v1657_v56, %s2879_s30  ;;  %v2520_v33 = vpop.f32.mrb[31].mxu0  ;;  %v98_v56 = vld [vmem:[#allocation11 + $0x3] ss:$0 sm:$0xff]  ;;  %s2894_s30 = smov [#allocation12]  }
 0x724   :  { %s2166_s7 = sshll.u32 %s2894_s30, 4  ;;  %s2167_s7 = int_to_ptr.vmem [resolvable:$true] %s2166_s7 }
 0x725   :  { %s2847_s8 = scalar_lea.vmem %s2167_s7, 256  ;;  %p2852_p13 = scmp.lt.s32.totalorder %s2167_s7, %s2167_s7 }
 0x726   :  { %p2848_p12 = scmp.ne.s32.totalorder %s2167_s7, %s2847_s8  ;;  %p2853_p0 = scmp.lt.s32.totalorder %s2847_s8, %s2847_s8 }
 0x728   :  { %v1599_v34 = vpop.f32.mrb[32].mxu0  ;;  %p2854_p1 = por %p2853_p0, %p2852_p13 }
 0x729   :  { %v1664_v36 = vpack.c.bf16 %v1642_v20, %v1599_v34  ;;  %v2531_v59 = vpop.f32.mrb[33].mxu0  ;;  %v2687_v20 = vld [vmem:[#allocation9 + $0x68] sm:$0xff]   ;;  %v99_v34 = vld [vmem:[#allocation11 + $0x4] ss:$0 sm:$0xff] }
 0x72a   :  { %v1602_v37 = vpop.f32.mrb[34].mxu0  ;;  %p2855_p2 = pnand %p2854_p1, %p2848_p12 }
 0x72b   :  { %1666 = vrot.lane.b32.xlu0 %v1664_v36, %s2892_s4  ;;  %v2532_v60 = vpop.f32.mrb[35].mxu0 }
 0x764   :  { %v1653_v39 = vpop.permute.xlu0 %1652 }
 0x765   :  { %1656 = vst.msk [vmem:[#allocation2] sm:$0xff] %vm1655_vm8, %v1653_v39  ;;  %v2688_v39 = vld [vmem:[#allocation9 + $0x28] sm:$0xff]  }
 0x795   :  { %v1660_v30 = vpop.permute.xlu1 %1659 }
 0x796   :  { %1663 = vst.msk [vmem:[#allocation2] sm:$0xff] %vm1662_vm9, %v1660_v30  ;;  %v2689_v30 = vld [vmem:[#allocation9 + $0x70] sm:$0xff]  }
 0x79d   :  { %v1667_v0 = vpop.permute.xlu0 %1666 }
 0x79e   :  { %1670 = vst.msk [vmem:[#allocation2] sm:$0xff] %vm1669_vm10, %v1667_v0  ;;  %v2690_v0 = vld [vmem:[#allocation9 + $0x30] sm:$0xff]  }
 0x7a5   :  { %v1671_v40 = vld [vmem:[#allocation2] sm:$0xff] }
 0x7a6   :  { %2556 = vmatmul.mubr.bf16.vlgmr.msra.gmra.mrb[36].mxu0 %v1671_v40  ;;  %v2691_v40 = vld [vmem:[#allocation9 + $0x78] sm:$0xff]  }
 0x7a7   :  { %2370 = vmatpush3.bf16.msra.mxu0 %v2678_v10 }
 0x7a8   :  { %2371 = vmatprep.subr.bf16.mxu0 %v2679_v11 }
 0x7ab   :  { %2372 = vmatpush3.bf16.msra.mxu0 %v2680_v12 }
 0x7ac   :  { %2373 = vmatprep.subr.bf16.mxu0 %v2681_v13 }
 0x7af   :  { %2374 = vmatpush3.bf16.msra.mxu0 %v2682_v14 }
 0x7b0   :  { %2375 = vmatprep.subr.bf16.mxu0 %v2683_v9 }
 0x7b3   :  { %2376 = vmatpush3.bf16.msra.mxu0 %v2684_v17 }
 0x7b4   :  { %2377 = vmatprep.subr.bf16.mxu0 %v2685_v18 }
 0x7b7   :  { %2378 = vmatpush3.bf16.msra.mxu0 %v2686_v19 }
 0x7b8   :  { %2379 = vmatprep.subr.bf16.mxu0 %v2687_v20 }
 0x7bb   :  { %2380 = vmatpush3.bf16.msra.mxu0 %v2688_v39 }
 0x7bc   :  { %2381 = vmatprep.subr.bf16.mxu0 %v2689_v30 }
 0x7bf   :  { %2382 = vmatpush3.bf16.msra.mxu0 %v2690_v0 }
 0x7c0   :  { %2383 = vmatprep.subr.bf16.mxu0 %v2691_v40 }
 0x879   :  { %v1770_v41 = vpop.f32.mrb[36].mxu0 }
 0x87a   :  { %v1777_v38 = vadd.f32 %v1770_v41, %v3052_v15  ;;  %v2557_v35 = vpop.f32.mrb[37].mxu0  ;;  %v2692_v41 = vld [vmem:[#allocation9 + $0x38] sm:$0xff]  }
 0x87b   :  { %v1773_v42 = vpop.f32.mrb[38].mxu0  ;;  %2384 = vmatpush3.bf16.msra.mxu0 %v2692_v41  ;;  %v1829_v35 = vsub.s32 1, %v3130_v24 }
 0x87c   :  { %v1778_v43 = vadd.f32 %v1773_v42, %v3054_v16  ;;  %1779 = vadd.xlane.f32.xlu1 %v1777_v38  ;;  %v2558_v44 = vpop.f32.mrb[39].mxu0 }
 0x87e   :  { %1781 = vadd.xlane.f32.xlu0 %v1778_v43 }
 0x909   :  { %v1780_v49 = vpop.xlane.xlu1 %1779 }
 0x90a   :  { %v1783_v50 = vmul.f32 0.0078125, %v1780_v49 }
 0x90b   :  { %v1782_v55 = vpop.xlane.xlu0 %1781 }
 0x90c   :  { %v1785_v51 = vsub.f32 %v1777_v38, %v1783_v50  ;;  %v1784_v15 = vmul.f32 0.0078125, %v1782_v55  ;;  %v104_v38 = vld [vmem:[#allocation11 + $0x10] ss:$8 sm:$0x3] }
 0x90d   :  { %v1826_v42 = vrot.slane %v104_v38, %v3133_v26 }
 0x90e   :  { %v3232_v52 = vsub.f32 %v1778_v43, %v1784_v15  ;;  %v1787_v54 = vmul.f32 %v1785_v51, %v1785_v51  ;;  %v1830_v43 = vrot.slane %v104_v38, %v1829_v35 }
 0x910   :  { %1789 = vadd.xlane.f32.xlu0 %v1787_v54  ;;  %v1788_v16 = vmul.f32 %v3232_v52, %v3232_v52 }
 0x914   :  { %1791 = vadd.xlane.f32.xlu0 %v1788_v16 }
 0x99d   :  { %v1790_v62 = vpop.xlane.xlu0 %1789 }
 0x99e   :  { %v1793_v21 = vmul.f32 0.0078125, %v1790_v62 }
 0x9a0   :  { %v1795_v22 = vadd.f32 1e-05, %v1793_v21 }
 0x9a1   :  { %v1792_v23 = vpop.xlane.xlu0 %1791 }
 0x9a2   :  { %2729 = vrsqrt.f32 %v1795_v22  ;;  %v1794_v25 = vmul.f32 0.0078125, %v1792_v23  ;;  %v100_v22 = vld [vmem:[#allocation11 + $0x5] ss:$0 sm:$0xff] }
 0x9a4   :  { %v1796_v27 = vadd.f32 1e-05, %v1794_v25 }
 0x9a6   :  { %2731 = vrsqrt.f32 %v1796_v27  ;;  %v101_v27 = vld [vmem:[#allocation11 + $0x6] ss:$0 sm:$0xff] }
 0x9ac   :  { %v2730_v28 = vpop.eup %2729 }
 0x9ad   :  { %v1799_v29 = vmul.f32 %v2730_v28, %v1785_v51 }
 0x9af   :  { %v1801_v33 = vmul.f32 %v1799_v29, %v98_v56 }
 0x9b0   :  { %v2732_v31 = vpop.eup %2731 }
 0x9b1   :  { %v1800_v32 = vmul.f32 %v2732_v31, %v3232_v52  ;;  %v1803_v59 = vadd.f32 %v1801_v33, %v99_v34 }
 0x9b3   :  { %v1802_v36 = vmul.f32 %v1800_v32, %v98_v56 }
 0x9b5   :  { %v1804_v37 = vadd.f32 %v1802_v36, %v99_v34 }
 0x9b7   :  { %v1805_v60 = vpack.c.bf16 %v1804_v37, %v1803_v59 }
 0x9b9   :  { %1946 = vmatmul.mubr.bf16.vlgmr.msra.gmra.mrb[52].mxu1 %v1805_v60 }
 0xa8c   :  { %v1947_v44 = vpop.f32.mrb[52].mxu1 }
 0xa8d   :  { %v1948_v45 = vadd.f32 %v1947_v44, %v1826_v42  ;;  %v1949_v46 = vpop.f32.mrb[53].mxu1 }
 0xa8e   :  { %v1950_v47 = vadd.f32 %v1949_v46, %v1830_v43  ;;  %v1951_v48 = vpop.f32.mrb[54].mxu1 }
 0xa8f   :  { %v1952_v49 = vadd.f32 %v1951_v48, %v1826_v42  ;;  %v1953_v50 = vpop.f32.mrb[55].mxu1  ;;  %v1956_v51 = vmax.f32 %v1948_v45, 0.0 }
 0xa90   :  { %v1954_v55 = vadd.f32 %v1953_v50, %v1830_v43  ;;  %v1957_v52 = vmax.f32 %v1950_v47, 0.0 }
 0xa91   :  { %v1958_v15 = vmax.f32 %v1952_v49, 0.0 }
 0xa92   :  { %v1959_v54 = vmax.f32 %v1954_v55, 0.0 }
 0xa93   :  { %v1960_v16 = vpack.c.bf16 %v1958_v15, %v1956_v51 }
 0xa94   :  { %v1961_v57 = vpack.c.bf16 %v1959_v54, %v1957_v52 }
 0xa96   :  { %2122 = vmatprep.mubr.bf16.mxu0 %v1961_v57 }
 0xa97   :  { %2123 = vmatmul.mubr.bf16.vlgmr.msra.gmra.mrb[40].mxu0 %v1960_v16 }
 0xb6a   :  { %v2385_v24 = vpop.f32.mrb[40].mxu0 }
 0xb6b   :  { %v2386_v26 = vpop.f32.mrb[41].mxu0 }
 0xb6c   :  { %v2387_v58 = vadd.f32 %v2386_v26, %v2385_v24  ;;  %v2388_v61 = vpop.f32.mrb[42].mxu0 }
 0xb6d   :  { %v2389_v63 = vpop.f32.mrb[43].mxu0 }
 0xb6e   :  { %v2125_v1 = vadd.f32 %v2387_v58, %v102_v53  ;;  %v2390_v2 = vadd.f32 %v2389_v63, %v2388_v61 }
 0xb70   :  { %v2128_v3 = vadd.f32 %v2390_v2, %v102_v53  ;;  %v2131_v4 = vadd.f32 %v2125_v1, %v1803_v59 }
 0xb72   :  { %2133 = vadd.xlane.f32.xlu1 %v2131_v4  ;;  %v2132_v5 = vadd.f32 %v2128_v3, %v1804_v37 }
 0xb74   :  { %2135 = vadd.xlane.f32.xlu0 %v2132_v5 }
 0xbff   :  { %v2134_v6 = vpop.xlane.xlu1 %2133 }
 0xc00   :  { %v2137_v7 = vmul.f32 0.0078125, %v2134_v6 }
 0xc01   :  { %v2136_v8 = vpop.xlane.xlu0 %2135 }
 0xc02   :  { %v2139_v10 = vsub.f32 %v2131_v4, %v2137_v7  ;;  %v2138_v11 = vmul.f32 0.0078125, %v2136_v8 }
 0xc04   :  { %v2140_v12 = vsub.f32 %v2132_v5, %v2138_v11  ;;  %v2141_v13 = vmul.f32 %v2139_v10, %v2139_v10 }
 0xc06   :  { %2143 = vadd.xlane.f32.xlu1 %v2141_v13  ;;  %v2142_v14 = vmul.f32 %v2140_v12, %v2140_v12 }
 0xc08   :  { %2145 = vadd.xlane.f32.xlu0 %v2142_v14 }
 0xc93   :  { %v2144_v9 = vpop.xlane.xlu1 %2143 }
 0xc94   :  { %v2147_v17 = vmul.f32 0.0078125, %v2144_v9 }
 0xc95   :  { %v2146_v18 = vpop.xlane.xlu0 %2145 }
 0xc96   :  { %v2149_v19 = vadd.f32 1e-05, %v2147_v17  ;;  %v2148_v20 = vmul.f32 0.0078125, %v2146_v18 }
 0xc98   :  { %2733 = vrsqrt.f32 %v2149_v19  ;;  %v2150_v62 = vadd.f32 1e-05, %v2148_v20 }
 0xc9a   :  { %2735 = vrsqrt.f32 %v2150_v62 }
 0xca2   :  { %v2734_v21 = vpop.eup %2733 }
 0xca3   :  { %v2153_v23 = vmul.f32 %v2734_v21, %v2139_v10 }
 0xca4   :  { %v2736_v25 = vpop.eup %2735 }
 0xca5   :  { %v2154_v28 = vmul.f32 %v2736_v25, %v2140_v12  ;;  %v2155_v29 = vmul.f32 %v2153_v23, %v100_v22 }
 0xca7   :  { %v2156_v56 = vmul.f32 %v2154_v28, %v100_v22  ;;  %v2157_v31 = vadd.f32 %v2155_v29, %v101_v27 }
 0xca9   :  { %v2158_v32 = vadd.f32 %v2156_v56, %v101_v27  ;;  %2159 = vst [vmem:[#allocation12] sm:$0xff] %v2157_v31 }
 0xcab   :  { %2160 = vst [vmem:[#allocation12 + $0x8] sm:$0xff] %v2158_v32 }
 0xcac   :  { %2858 = shalt.err (!%p2855_p2)
}
 0xcad   :  { %s2859_s11 = scalar_lea.hbm %s3256_s5, 256 }
 0xcae   :  { %p2860_p3 = scmp.ne.s32.totalorder %s3256_s5, %s2859_s11  ;;  %p2863_p4 = scmp.lt.u32.totalorder %s2859_s11, %s3256_s5 }
 0xcb0   :  { %p2865_p5 = pnand %p2863_p4, %p2860_p3 }
 0xcb2   :  { %2868 = shalt.err (!%p2865_p5)
}
 0xcb3   :  { %s2895_s0 = smov 128   ;;  %s2896_s6 = smov 8  }
 0xcb4   :  { %2172 = dma.vmem_to_hbm [thread:$0]  %s2167_s7, 256, %s3256_s5, [#allocation5], %s2895_s0, %s2895_s0, %s2896_s6  }
 0xcb5   :  { %2875 = dma.done.wait [#allocation5], 256  }
 0xcb6   :  { %2876 = vsyncadd [#allocation5], 4294967040 }
 0xcb7   :  { %2176 = vsyncpa [#allocation4], 1 }
 0xcb8   :  { %2177 = vsyncpa [#allocation7], 1 }
 0xcb9   :  { %2178 = vsyncpa [#allocation10], 1 }
 0xcba   :  { %2179 = vsyncpa [#allocation5], 1 }

</bundles_post_ra>
